<compile_context>
chip_gen: v5e
topology: v5e:2x2
jax: 0.10.0
libtpu: 0.0.40
codegen_flags: <defaults>
</compile_context>

<pallas_src>
import jax
import jax.numpy as jnp
from jax.experimental import pallas as pl
from jax.experimental.pallas import tpu as pltpu


def _round_up(n, m):
    return (n + m - 1) // m * m


def qnet_kernel(x_ref, w1_ref, b1_ref, w2_ref, b2_ref, w3_ref, b3_ref, o_ref):
    # fc1 + ReLU (bf16 operands, f32 accumulation on the MXU); downcast fused into ReLU
    h1 = jnp.dot(x_ref[...], w1_ref[...], preferred_element_type=jnp.float32)
    h1 = jnp.maximum(h1 + b1_ref[...], 0.0).astype(w2_ref.dtype)
    # fc2 + ReLU
    h2 = jnp.dot(h1, w2_ref[...], preferred_element_type=jnp.float32)
    h2 = jnp.maximum(h2 + b2_ref[...], 0.0).astype(w3_ref.dtype)
    # fc3 (no activation)
    out = jnp.dot(h2, w3_ref[...], preferred_element_type=jnp.float32)
    o_ref[...] = (out + b3_ref[...]).astype(o_ref.dtype)


def prepare_params(params, *, compute_dtype=jnp.bfloat16):
    """One-time host-side prep: pad state/action dims to 128 lanes, cast weights to
    bf16 (halves HBM weight traffic; zero padding leaves matmul results unchanged).
    Call once; reuse the result for every forward call."""
    S, H1 = params["w1"].shape
    H2, A = params["w3"].shape
    S_pad = _round_up(S, 128)
    A_pad = _round_up(A, 128)

    w1 = jnp.zeros((S_pad, H1), compute_dtype).at[:S, :].set(params["w1"].astype(compute_dtype))
    w2 = params["w2"].astype(compute_dtype)
    w3 = jnp.zeros((H2, A_pad), compute_dtype).at[:, :A].set(params["w3"].astype(compute_dtype))
    b1 = params["b1"].astype(jnp.float32).reshape(1, H1)
    b2 = params["b2"].astype(jnp.float32).reshape(1, H2)
    b3 = jnp.zeros((1, A_pad), jnp.float32).at[:, :A].set(
        params["b3"].astype(jnp.float32).reshape(1, A))

    return dict(w1=w1, b1=b1, w2=w2, b2=b2, w3=w3, b3=b3,
                state_size=S, action_size=A)


def qnetwork_forward(x, prep, *, batch_tile=1024, out_dtype=jnp.float32):
    """x: (B, state_size) float32. prep: output of prepare_params()."""
    B, S = x.shape
    assert S == prep["state_size"]
    A = prep["action_size"]
    compute_dtype = prep["w1"].dtype
    S_pad = prep["w1"].shape[0]
    A_pad = prep["w3"].shape[1]

    # Batch tiling: multiple of 16 (bf16 packs 16 rows per sublane-packed vreg),
    # minimal padding waste, and >=2 grid steps for large B so the "parallel"
    # axis shards across both v7x TensorCores (harmless serial steps on v5e/v6e).
    B16 = _round_up(B, 16)
    n_tiles = pl.cdiv(B16, batch_tile)
    if B >= 256:
        n_tiles = max(n_tiles, 2)
    TB = _round_up(pl.cdiv(B16, n_tiles), 16)
    B_pad = n_tiles * TB

    # Per-call activation padding (cheap: only the x tile, not the weights).
    xp = jnp.zeros((B_pad, S_pad), compute_dtype).at[:B, :S].set(x.astype(compute_dtype))

    def batch_spec(cols):
        return pl.BlockSpec((TB, cols), lambda i: (i, 0))

    def resident(shape):
        # Same block index every grid step -> stays VMEM-resident (no re-DMA).
        return pl.BlockSpec(shape, lambda i: (0,) * len(shape))

    out_padded = pl.pallas_call(
        qnet_kernel,
        out_shape=jax.ShapeDtypeStruct((B_pad, A_pad), out_dtype),
        grid=(n_tiles,),
        in_specs=[
            batch_spec(S_pad),
            resident(prep["w1"].shape), resident(prep["b1"].shape),
            resident(prep["w2"].shape), resident(prep["b2"].shape),
            resident(prep["w3"].shape), resident(prep["b3"].shape),
        ],
        out_specs=batch_spec(A_pad),
        compiler_params=pltpu.CompilerParams(
            dimension_semantics=("parallel",),
        ),
    )(xp, prep["w1"], prep["b1"], prep["w2"], prep["b2"], prep["w3"], prep["b3"])

    return out_padded[:B, :A]


def init_params(key, state_size, action_size):
    """Deterministic init matching PyTorch nn.Linear default: U(-1/sqrt(fan_in), ...)."""
    def linear(k, fan_in, fan_out):
        kw, kb = jax.random.split(k)
        bound = 1.0 / jnp.sqrt(fan_in)
        w = jax.random.uniform(kw, (fan_in, fan_out), jnp.float32, -bound, bound)
        b = jax.random.uniform(kb, (fan_out,), jnp.float32, -bound, bound)
        return w, b

    k1, k2, k3 = jax.random.split(key, 3)
    w1, b1 = linear(k1, state_size, 1024)
    w2, b2 = linear(k2, 1024, 512)
    w3, b3 = linear(k3, 512, action_size)
    return dict(w1=w1, b1=b1, w2=w2, b2=b2, w3=w3, b3=b3)


def reference_forward(x, p, compute_dtype=jnp.bfloat16):
    """Pure-JAX reference with the same bf16-operand / f32-accumulate numerics.
    NOTE: intentionally NOT bit-equivalent to a full-f32 PyTorch QNetwork; the
    bf16 weight/activation cast is a deliberate perf choice (fine for DQN)."""
    cast = lambda a: a.astype(compute_dtype).astype(jnp.float32)
    h1 = jnp.maximum(cast(x) @ cast(p["w1"]) + p["b1"], 0.0)
    h2 = jnp.maximum(cast(h1) @ cast(p["w2"]) + p["b2"], 0.0)
    return cast(h2) @ cast(p["w3"]) + p["b3"]


if __name__ == "__main__":
    state_size = 37   # e.g. Banana-navigation state dim
    action_size = 4
    batch = 8

    key = jax.random.PRNGKey(0)
    k_params, k_x = jax.random.split(key)
    params = init_params(k_params, state_size, action_size)
    x = jax.random.normal(k_x, (batch, state_size), dtype=jnp.float32)

    prep = prepare_params(params)            # one-time weight prep (hoisted off hot path)
    out = qnetwork_forward(x, prep)
    out = jax.block_until_ready(out)

    ref = reference_forward(x, params)
    assert out.shape == (batch, action_size)
    assert jnp.allclose(out, ref, atol=1e-3, rtol=1e-3), "mismatch vs JAX reference"

    print("KERNEL_OK")
</pallas_src>

<mosaic_0001>
module attributes {stable_mosaic.version = 11 : i64} {
  func.func @qnet_kernel(%arg0: i32, %arg1: memref<16x128xbf16, #tpu.memory_space<vmem>>, %arg2: memref<128x1024xbf16, #tpu.memory_space<vmem>>, %arg3: memref<1x1024xf32, #tpu.memory_space<vmem>>, %arg4: memref<1024x512xbf16, #tpu.memory_space<vmem>>, %arg5: memref<1x512xf32, #tpu.memory_space<vmem>>, %arg6: memref<512x128xbf16, #tpu.memory_space<vmem>>, %arg7: memref<1x128xf32, #tpu.memory_space<vmem>>, %arg8: memref<16x128xf32, #tpu.memory_space<vmem>>) attributes {dimension_semantics = [#tpu.dimension_semantics<parallel>], iteration_bounds = array<i64: 1>, scalar_prefetch = 0 : i64, scratch_operands = 0 : i64, tpu.core_type = #tpu.core_type<tc>, window_params = [{transform_indices = @transform_0, window_bounds = array<i64: 16, 128>}, {pipeline_mode = #tpu.pipeline_mode<synchronous>, transform_indices = @transform_1, window_bounds = array<i64: 128, 1024>}, {pipeline_mode = #tpu.pipeline_mode<synchronous>, transform_indices = @transform_2, window_bounds = array<i64: 1, 1024>}, {pipeline_mode = #tpu.pipeline_mode<synchronous>, transform_indices = @transform_3, window_bounds = array<i64: 1024, 512>}, {pipeline_mode = #tpu.pipeline_mode<synchronous>, transform_indices = @transform_4, window_bounds = array<i64: 1, 512>}, {pipeline_mode = #tpu.pipeline_mode<synchronous>, transform_indices = @transform_5, window_bounds = array<i64: 512, 128>}, {pipeline_mode = #tpu.pipeline_mode<synchronous>, transform_indices = @transform_6, window_bounds = array<i64: 1, 128>}, {transform_indices = @transform_7, window_bounds = array<i64: 16, 128>}]} {
    %c0 = arith.constant 0 : index
    %c0_0 = arith.constant 0 : index
    %0 = vector.load %arg1[%c0, %c0_0] : memref<16x128xbf16, #tpu.memory_space<vmem>>, vector<16x128xbf16>
    %c0_1 = arith.constant 0 : index
    %c0_2 = arith.constant 0 : index
    %1 = vector.load %arg2[%c0_1, %c0_2] : memref<128x1024xbf16, #tpu.memory_space<vmem>>, vector<128x1024xbf16>
    %cst = arith.constant dense<0.000000e+00> : vector<16x1024xf32>
    %2 = tpu.matmul %0, %1, %cst {dimension_numbers = #tpu.dot_dimension_numbers<[1], [0], [0], [1], [0, 0, 1, 1], [], []>} : vector<16x128xbf16>, vector<128x1024xbf16>, vector<16x1024xf32> -> vector<16x1024xf32>
    %c0_3 = arith.constant 0 : index
    %c0_4 = arith.constant 0 : index
    %3 = vector.load %arg3[%c0_3, %c0_4] : memref<1x1024xf32, #tpu.memory_space<vmem>>, vector<1x1024xf32>
    %4 = vector.broadcast %3 : vector<1x1024xf32> to vector<16x1024xf32>
    %5 = arith.addf %2, %4 : vector<16x1024xf32>
    %cst_5 = arith.constant 0.000000e+00 : f32
    %6 = vector.broadcast %cst_5 : f32 to vector<16x1024xf32>
    %7 = arith.maximumf %5, %6 : vector<16x1024xf32>
    %8 = arith.truncf %7 : vector<16x1024xf32> to vector<16x1024xbf16>
    %c0_6 = arith.constant 0 : index
    %c0_7 = arith.constant 0 : index
    %9 = vector.load %arg4[%c0_6, %c0_7] : memref<1024x512xbf16, #tpu.memory_space<vmem>>, vector<1024x512xbf16>
    %cst_8 = arith.constant dense<0.000000e+00> : vector<16x512xf32>
    %10 = tpu.matmul %8, %9, %cst_8 {dimension_numbers = #tpu.dot_dimension_numbers<[1], [0], [0], [1], [0, 0, 1, 1], [], []>} : vector<16x1024xbf16>, vector<1024x512xbf16>, vector<16x512xf32> -> vector<16x512xf32>
    %c0_9 = arith.constant 0 : index
    %c0_10 = arith.constant 0 : index
    %11 = vector.load %arg5[%c0_9, %c0_10] : memref<1x512xf32, #tpu.memory_space<vmem>>, vector<1x512xf32>
    %12 = vector.broadcast %11 : vector<1x512xf32> to vector<16x512xf32>
    %13 = arith.addf %10, %12 : vector<16x512xf32>
    %cst_11 = arith.constant 0.000000e+00 : f32
    %14 = vector.broadcast %cst_11 : f32 to vector<16x512xf32>
    %15 = arith.maximumf %13, %14 : vector<16x512xf32>
    %16 = arith.truncf %15 : vector<16x512xf32> to vector<16x512xbf16>
    %c0_12 = arith.constant 0 : index
    %c0_13 = arith.constant 0 : index
    %17 = vector.load %arg6[%c0_12, %c0_13] : memref<512x128xbf16, #tpu.memory_space<vmem>>, vector<512x128xbf16>
    %cst_14 = arith.constant dense<0.000000e+00> : vector<16x128xf32>
    %18 = tpu.matmul %16, %17, %cst_14 {dimension_numbers = #tpu.dot_dimension_numbers<[1], [0], [0], [1], [0, 0, 1, 1], [], []>} : vector<16x512xbf16>, vector<512x128xbf16>, vector<16x128xf32> -> vector<16x128xf32>
    %c0_15 = arith.constant 0 : index
    %c0_16 = arith.constant 0 : index
    %19 = vector.load %arg7[%c0_15, %c0_16] : memref<1x128xf32, #tpu.memory_space<vmem>>, vector<1x128xf32>
    %20 = vector.broadcast %19 : vector<1x128xf32> to vector<16x128xf32>
    %21 = arith.addf %18, %20 : vector<16x128xf32>
    %c0_17 = arith.constant 0 : index
    %c0_18 = arith.constant 0 : index
    %22 = vector.load %arg8[%c0_17, %c0_18] : memref<16x128xf32, #tpu.memory_space<vmem>>, vector<16x128xf32>
    tpu.vector_store %arg8[%c0_17, %c0_18], %21 {strides = array<i32>} : memref<16x128xf32, #tpu.memory_space<vmem>>, vector<16x128xf32>,
    return
  }
  func.func @transform_0(%arg0: i32) -> (i32, i32) {
    %c0_i32 = arith.constant 0 : i32
    %c0_i32_0 = arith.constant 0 : i32
    return %arg0, %c0_i32 : i32, i32
  }
  func.func @transform_1(%arg0: i32) -> (i32, i32) {
    %c0_i32 = arith.constant 0 : i32
    %c0_i32_0 = arith.constant 0 : i32
    %c0_i32_1 = arith.constant 0 : i32
    return %c0_i32, %c0_i32_0 : i32, i32
  }
  func.func @transform_2(%arg0: i32) -> (i32, i32) {
    %c0_i32 = arith.constant 0 : i32
    %c0_i32_0 = arith.constant 0 : i32
    %c0_i32_1 = arith.constant 0 : i32
    return %c0_i32, %c0_i32_0 : i32, i32
  }
  func.func @transform_3(%arg0: i32) -> (i32, i32) {
    %c0_i32 = arith.constant 0 : i32
    %c0_i32_0 = arith.constant 0 : i32
    %c0_i32_1 = arith.constant 0 : i32
    return %c0_i32, %c0_i32_0 : i32, i32
  }
  func.func @transform_4(%arg0: i32) -> (i32, i32) {
    %c0_i32 = arith.constant 0 : i32
    %c0_i32_0 = arith.constant 0 : i32
    %c0_i32_1 = arith.constant 0 : i32
    return %c0_i32, %c0_i32_0 : i32, i32
  }
  func.func @transform_5(%arg0: i32) -> (i32, i32) {
    %c0_i32 = arith.constant 0 : i32
    %c0_i32_0 = arith.constant 0 : i32
    %c0_i32_1 = arith.constant 0 : i32
    return %c0_i32, %c0_i32_0 : i32, i32
  }
  func.func @transform_6(%arg0: i32) -> (i32, i32) {
    %c0_i32 = arith.constant 0 : i32
    %c0_i32_0 = arith.constant 0 : i32
    %c0_i32_1 = arith.constant 0 : i32
    return %c0_i32, %c0_i32_0 : i32, i32
  }
  func.func @transform_7(%arg0: i32) -> (i32, i32) {
    %c0_i32 = arith.constant 0 : i32
    %c0_i32_0 = arith.constant 0 : i32
    return %arg0, %c0_i32 : i32, i32
  }
}

</mosaic_0001>

<bundles_post_ra>
// kernel: tpu_custom_call.1
= control target key start
LH: loop header
LB: loop body
LE: loop exit
PB: predicated region body
PF: predicated region fallthrough
CT: control target
= control target key end

     0   :  { %12 = vsyncpa [#allocation3], 0  ;;  %s5163_s0 = inlined_call_operand.hbm [shape: bf16[16,128], index: 0, kind: input, shape index: {}]   ;;  %s5164_s1 = inlined_call_operand.hbm [shape: bf16[128,1024], index: 1, kind: input, shape index: {}]   ;;  %s5165_s2 = inlined_call_operand.hbm [shape: f32[1,1024], index: 2, kind: input, shape index: {}]   ;;  %s5166_s3 = inlined_call_operand.hbm [shape: bf16[1024,512], index: 3, kind: input, shape index: {}]   ;;  %s5167_s4 = inlined_call_operand.hbm [shape: f32[1,512], index: 4, kind: input, shape index: {}]   ;;  %s5168_s5 = inlined_call_operand.hbm [shape: bf16[512,128], index: 5, kind: input, shape index: {}]   ;;  %s5169_s6 = inlined_call_operand.vmem [shape: f32[1,128], index: 6, kind: input, shape index: {}]   ;;  %s5170_s7 = inlined_call_operand.hbm [shape: f32[16,128], index: 7, kind: output, shape index: {}]  }
   0x1   :  { %13 = vsyncpa [#allocation6], 0 }
   0x2   :  { %14 = vsyncpa [#allocation9], 0 }
   0x3   :  { %15 = vsyncpa [#allocation12], 0  ;;  %s34_s26 = sshll.u32 %s5164_s1, 4  ;;  %s35_s26 = int_to_ptr.hbm [resolvable:$true] %s34_s26 }
   0x4   :  { %16 = vsyncpa [#allocation4], 0  ;;  %s4968_s27 = smov [#allocation5]   ;;  %s58_s8 = sshll.u32 %s5166_s3, 4  ;;  %s59_s8 = int_to_ptr.hbm [resolvable:$true] %s58_s8 }
   0x5   :  { %s36_s28 = sshll.u32 %s4968_s27, 4  ;;  %s4969_s9 = smov 512   ;;  %s37_s28 = int_to_ptr.vmem [resolvable:$true] %s36_s28 }
   0x6   :  { %s4970_s10 = smov 32   ;;  %s4971_s11 = smov [#allocation8]  }
   0x7   :  { %42 = dma.hbm_to_vmem [thread:$0]  %s35_s26, 8192, %s37_s28, [#allocation6], %s4969_s9, %s4969_s9, %s4970_s10  }
   0x8   :  { %s60_s12 = sshll.u32 %s4971_s11, 4  ;;  %s4972_s13 = smov 256   ;;  %s61_s12 = int_to_ptr.vmem [resolvable:$true] %s60_s12 }
   0x9   :  { %s4973_s14 = smov 16   ;;  %s21_s16 = sshll.u32 %s5163_s0, 4  ;;  %s22_s16 = int_to_ptr.hbm [resolvable:$true] %s21_s16 }
   0xa   :  { %66 = dma.hbm_to_vmem [thread:$0]  %s59_s8, 32768, %s61_s12, [#allocation9], %s4972_s13, %s4972_s13, %s4973_s14  }
   0xb   :  { %s4974_s17 = smov [#allocation2]   ;;  %s48_s20 = sshll.u32 %s5165_s2, 4  ;;  %s49_s20 = int_to_ptr.hbm [resolvable:$true] %s48_s20 }
   0xc   :  { %s23_s18 = sshll.u32 %s4974_s17, 4  ;;  %s4975_s21 = smov 64   ;;  %s24_s18 = int_to_ptr.vmem [resolvable:$true] %s23_s18 }
   0xd   :  { %s4976_s22 = smov 4   ;;  %s4977_s23 = smov [#allocation7]  }
   0xe   :  { %29 = dma.hbm_to_vmem [thread:$0]  %s22_s16, 128, %s24_s18, [#allocation3], %s4975_s21, %s4975_s21, %s4976_s22  }
   0xf   :  { %s50_s24 = sshll.u32 %s4977_s23, 4  ;;  %s72_s27 = sshll.u32 %s5167_s4, 4  ;;  %s51_s24 = int_to_ptr.vmem [resolvable:$true] %s50_s24  ;;  %s73_s27 = int_to_ptr.hbm [resolvable:$true] %s72_s27 }
  0x10   :  { %53 = dma.hbm_to_vmem [thread:$0]  %s49_s20, 128, %s51_s24, [#allocation6]  }
  0x11   :  { %s82_s29 = sshll.u32 %s5168_s5, 4  ;;  %s4978_s30 = smov [#allocation10]   ;;  %s83_s29 = int_to_ptr.hbm [resolvable:$true] %s82_s29 }
  0x12   :  { %s74_s8 = sshll.u32 %s4978_s30, 4  ;;  %s4979_s2 = smov [#allocation11]   ;;  %s75_s8 = int_to_ptr.vmem [resolvable:$true] %s74_s8 }
  0x13   :  { %77 = dma.hbm_to_vmem [thread:$0]  %s73_s27, 64, %s75_s8, [#allocation9]  }
  0x14   :  { %s84_s9 = sshll.u32 %s4979_s2, 4  ;;  %s85_s9 = int_to_ptr.vmem [resolvable:$true] %s84_s9 }
  0x15   :  { %90 = dma.hbm_to_vmem [thread:$0]  %s83_s29, 4096, %s85_s9, [#allocation12], %s4975_s21, %s4975_s21, %s4976_s22  }
  0x16   :  { %4958 = dma.done.wait [#allocation3], 128  }
  0x17   :  { %4959 = vsyncadd [#allocation3], 4294967168 }
  0x18   :  { %4960 = dma.done.wait [#allocation6], 8320  }
  0x19   :  { %4961 = vsyncadd [#allocation6], 4294958976 }
  0x1a   :  { %4962 = dma.done.wait [#allocation9], 32832  }
  0x1b   :  { %4963 = vsyncadd [#allocation9], 4294934464 }
  0x1c   :  { %4964 = dma.done.wait [#allocation12], 4096  }
  0x1d   :  { %4965 = vsyncadd [#allocation12], 4294963200  ;;  %v3239_v0 = vld [vmem:[#allocation5 + $0x1c0] sm:$0xf]  ;;  %v4478_v2 = vld [vmem:[#allocation5 + $0x1c4] sm:$0xf] }
  0x1e   :  { %v4482_v1 = vld [vmem:[#allocation5 + $0x1dc] sm:$0xf0]  ;;  %v3241_v4 = vld [vmem:[#allocation5 + $0x1e0] sm:$0xf0]  ;;  %v3247_v5 = vld [vmem:[#allocation5 + $0x1c8] sm:$0xf] }
  0x1f   :  { %v3240_v3 = vor.u32 %v4482_v1, %v3239_v0  ;;  %v4483_v6 = vld [vmem:[#allocation5 + $0x1e4] sm:$0xf0]  ;;  %v3244_v7 = vor.u32 %v4478_v2, %v3241_v4  ;;  %v4479_v9 = vld [vmem:[#allocation5 + $0x1cc] sm:$0xf]  ;;  %v3207_v11 = vld [vmem:[#allocation5 + $0x180] sm:$0xf] }
  0x20   :  { %v3248_v8 = vor.u32 %v4483_v6, %v3247_v5  ;;  %v3249_v10 = vld [vmem:[#allocation5 + $0x1e8] sm:$0xf0]  ;;  %v4474_v13 = vld [vmem:[#allocation5 + $0x19c] sm:$0xf0]  ;;  %v4470_v14 = vld [vmem:[#allocation5 + $0x184] sm:$0xf] }
  0x21   :  { %527 = vmatpush.bf16.msra.mxu0 %v3240_v3  ;;  %v3252_v12 = vor.u32 %v4479_v9, %v3249_v10  ;;  %v3209_v15 = vld [vmem:[#allocation5 + $0x1a0] sm:$0xf0]  ;;  %541 = vmatpush.bf16.msra.mxu1 %v3244_v7  ;;  %v3208_v16 = vor.u32 %v4474_v13, %v3207_v11  ;;  %v3215_v18 = vld [vmem:[#allocation5 + $0x188] sm:$0xf]  ;;  %v4471_v20 = vld [vmem:[#allocation5 + $0x18c] sm:$0xf] }
  0x22   :  { %555 = vmatpush.bf16.msra.mxu2 %v3248_v8  ;;  %v3212_v17 = vor.u32 %v4470_v14, %v3209_v15  ;;  %v4475_v19 = vld [vmem:[#allocation5 + $0x1a4] sm:$0xf0]  ;;  %v3217_v22 = vld [vmem:[#allocation5 + $0x1a8] sm:$0xf0]  ;;  %v3175_v23 = vld [vmem:[#allocation5 + $0x140] sm:$0xf] }
  0x23   :  { %569 = vmatpush.bf16.msra.mxu3 %v3252_v12  ;;  %v3216_v21 = vor.u32 %v4475_v19, %v3215_v18  ;;  %v4466_v24 = vld [vmem:[#allocation5 + $0x15c] sm:$0xf0]  ;;  %v3220_v25 = vor.u32 %v4471_v20, %v3217_v22  ;;  %v4462_v26 = vld [vmem:[#allocation5 + $0x144] sm:$0xf]  ;;  %v3183_v28 = vld [vmem:[#allocation5 + $0x148] sm:$0xf] }
  0x24   :  { %v3177_v27 = vld [vmem:[#allocation5 + $0x160] sm:$0xf0]  ;;  %v3176_v29 = vor.u32 %v4466_v24, %v3175_v23  ;;  %v4467_v30 = vld [vmem:[#allocation5 + $0x164] sm:$0xf0]  ;;  %v4463_v31 = vld [vmem:[#allocation5 + $0x14c] sm:$0xf] }
  0x25   :  { %528 = vmatpush.bf16.msra.mxu0 %v3208_v16  ;;  %v3185_v32 = vld [vmem:[#allocation5 + $0x168] sm:$0xf0]  ;;  %542 = vmatpush.bf16.msra.mxu1 %v3212_v17  ;;  %v3180_v33 = vor.u32 %v4462_v26, %v3177_v27  ;;  %v3184_v34 = vor.u32 %v4467_v30, %v3183_v28  ;;  %v3143_v35 = vld [vmem:[#allocation5 + $0x100] sm:$0xf]  ;;  %v4454_v37 = vld [vmem:[#allocation5 + $0x104] sm:$0xf] }
  0x26   :  { %556 = vmatpush.bf16.msra.mxu2 %v3216_v21  ;;  %v4458_v36 = vld [vmem:[#allocation5 + $0x11c] sm:$0xf0]  ;;  %v3188_v38 = vor.u32 %v4463_v31, %v3185_v32  ;;  %v3145_v39 = vld [vmem:[#allocation5 + $0x120] sm:$0xf0]  ;;  %v3151_v40 = vld [vmem:[#allocation5 + $0x108] sm:$0xf] }
  0x27   :  { %570 = vmatpush.bf16.msra.mxu3 %v3220_v25  ;;  %v4459_v41 = vld [vmem:[#allocation5 + $0x124] sm:$0xf0]  ;;  %v4455_v42 = vld [vmem:[#allocation5 + $0x10c] sm:$0xf]  ;;  %v3144_v44 = vor.u32 %v4458_v36, %v3143_v35  ;;  %v3148_v45 = vor.u32 %v4454_v37, %v3145_v39  ;;  %v3111_v47 = vld [vmem:[#allocation5 + $0xc0] sm:$0xf] }
  0x28   :  { %v3153_v43 = vld [vmem:[#allocation5 + $0x128] sm:$0xf0]  ;;  %v3152_v46 = vor.u32 %v4459_v41, %v3151_v40  ;;  %v4450_v48 = vld [vmem:[#allocation5 + $0xdc] sm:$0xf0]  ;;  %v4446_v49 = vld [vmem:[#allocation5 + $0xc4] sm:$0xf] }
  0x29   :  { %529 = vmatpush.bf16.msra.mxu0 %v3176_v29  ;;  %543 = vmatpush.bf16.msra.mxu1 %v3180_v33  ;;  %v3156_v50 = vor.u32 %v4455_v42, %v3153_v43  ;;  %v3113_v51 = vld [vmem:[#allocation5 + $0xe0] sm:$0xf0]  ;;  %v3119_v52 = vld [vmem:[#allocation5 + $0xc8] sm:$0xf]  ;;  %v4447_v54 = vld [vmem:[#allocation5 + $0xcc] sm:$0xf]  ;;  %v3112_v56 = vor.u32 %v4450_v48, %v3111_v47 }
  0x2a   :  { %557 = vmatpush.bf16.msra.mxu2 %v3184_v34  ;;  %v4451_v53 = vld [vmem:[#allocation5 + $0xe4] sm:$0xf0]  ;;  %v3121_v55 = vld [vmem:[#allocation5 + $0xe8] sm:$0xf0]  ;;  %v3116_v57 = vor.u32 %v4446_v49, %v3113_v51  ;;  %v3079_v59 = vld [vmem:[#allocation5 + $0x80] sm:$0xf] }
  0x2b   :  { %571 = vmatpush.bf16.msra.mxu3 %v3188_v38  ;;  %v3120_v58 = vor.u32 %v4451_v53, %v3119_v52  ;;  %v4442_v60 = vld [vmem:[#allocation5 + $0x9c] sm:$0xf0]  ;;  %v4438_v61 = vld [vmem:[#allocation5 + $0x84] sm:$0xf]  ;;  %v3124_v62 = vor.u32 %v4447_v54, %v3121_v55  ;;  %v3087_v0 = vld [vmem:[#allocation5 + $0x88] sm:$0xf] }
  0x2c   :  { %v3081_v63 = vld [vmem:[#allocation5 + $0xa0] sm:$0xf0]  ;;  %v4443_v1 = vld [vmem:[#allocation5 + $0xa4] sm:$0xf0]  ;;  %v4439_v2 = vld [vmem:[#allocation5 + $0x8c] sm:$0xf]  ;;  %v3080_v4 = vor.u32 %v4442_v60, %v3079_v59 }
  0x2d   :  { %530 = vmatpush.bf16.msra.mxu0 %v3144_v44  ;;  %544 = vmatpush.bf16.msra.mxu1 %v3148_v45  ;;  %v3089_v3 = vld [vmem:[#allocation5 + $0xa8] sm:$0xf0]  ;;  %v3084_v5 = vor.u32 %v4438_v61, %v3081_v63  ;;  %v3088_v6 = vor.u32 %v4443_v1, %v3087_v0  ;;  %v3047_v7 = vld [vmem:[#allocation5 + $0x40] sm:$0xf]  ;;  %v4430_v9 = vld [vmem:[#allocation5 + $0x44] sm:$0xf] }
  0x2e   :  { %558 = vmatpush.bf16.msra.mxu2 %v3152_v46  ;;  %v4434_v8 = vld [vmem:[#allocation5 + $0x5c] sm:$0xf0]  ;;  %v3092_v10 = vor.u32 %v4439_v2, %v3089_v3  ;;  %v3049_v11 = vld [vmem:[#allocation5 + $0x60] sm:$0xf0]  ;;  %v3055_v12 = vld [vmem:[#allocation5 + $0x48] sm:$0xf] }
  0x2f   :  { %572 = vmatpush.bf16.msra.mxu3 %v3156_v50  ;;  %v4435_v13 = vld [vmem:[#allocation5 + $0x64] sm:$0xf0]  ;;  %v4431_v14 = vld [vmem:[#allocation5 + $0x4c] sm:$0xf]  ;;  %v3048_v16 = vor.u32 %v4434_v8, %v3047_v7  ;;  %v3015_v17 = vld [vmem:[#allocation5] sm:$0xf]  ;;  %v3052_v19 = vor.u32 %v4430_v9, %v3049_v11 }
  0x30   :  { %v3057_v15 = vld [vmem:[#allocation5 + $0x68] sm:$0xf0]  ;;  %v4426_v18 = vld [vmem:[#allocation5 + $0x1c] sm:$0xf0]  ;;  %v3056_v20 = vor.u32 %v4435_v13, %v3055_v12  ;;  %v4422_v21 = vld [vmem:[#allocation5 + $0x4] sm:$0xf] }
  0x31   :  { %531 = vmatpush.bf16.msra.mxu0 %v3112_v56  ;;  %545 = vmatpush.bf16.msra.mxu1 %v3116_v57  ;;  %v3017_v22 = vld [vmem:[#allocation5 + $0x20] sm:$0xf0]  ;;  %v3023_v23 = vld [vmem:[#allocation5 + $0x8] sm:$0xf]  ;;  %v3060_v24 = vor.u32 %v4431_v14, %v3057_v15  ;;  %v4423_v26 = vld [vmem:[#allocation5 + $0xc] sm:$0xf]  ;;  %v3016_v31 = vor.u32 %v4426_v18, %v3015_v17 }
  0x32   :  { %559 = vmatpush.bf16.msra.mxu2 %v3120_v58  ;;  %v4427_v25 = vld [vmem:[#allocation5 + $0x24] sm:$0xf0]  ;;  %v3025_v27 = vld [vmem:[#allocation5 + $0x28] sm:$0xf0]  ;;  %v3255_v28 = vld [vmem:[#allocation5 + $0x1d0] sm:$0xf]  ;;  %v3020_v35 = vor.u32 %v4422_v21, %v3017_v22 }
  0x33   :  { %573 = vmatpush.bf16.msra.mxu3 %v3124_v62  ;;  %v4484_v29 = vld [vmem:[#allocation5 + $0x1ec] sm:$0xf0]  ;;  %v4480_v30 = vld [vmem:[#allocation5 + $0x1d4] sm:$0xf]  ;;  %v3263_v33 = vld [vmem:[#allocation5 + $0x1d8] sm:$0xf]  ;;  %v3024_v36 = vor.u32 %v4427_v25, %v3023_v23  ;;  %v3028_v39 = vor.u32 %v4423_v26, %v3025_v27 }
  0x34   :  { %v3257_v32 = vld [vmem:[#allocation5 + $0x1f0] sm:$0xf0]  ;;  %v4485_v34 = vld [vmem:[#allocation5 + $0x1f4] sm:$0xf0]  ;;  %v4481_v37 = vld [vmem:[#allocation5 + $0x1dc] sm:$0xf]  ;;  %v3256_v40 = vor.u32 %v4484_v29, %v3255_v28 }
  0x35   :  { %532 = vmatpush.bf16.msra.mxu0 %v3080_v4  ;;  %546 = vmatpush.bf16.msra.mxu1 %v3084_v5  ;;  %v3265_v38 = vld [vmem:[#allocation5 + $0x1f8] sm:$0xf0]  ;;  %v3260_v42 = vor.u32 %v4480_v30, %v3257_v32  ;;  %v3264_v43 = vor.u32 %v4485_v34, %v3263_v33  ;;  %v3223_v44 = vld [vmem:[#allocation5 + $0x190] sm:$0xf]  ;;  %v4472_v46 = vld [vmem:[#allocation5 + $0x194] sm:$0xf] }
  0x36   :  { %560 = vmatpush.bf16.msra.mxu2 %v3088_v6  ;;  %v5041_v41 = vld [vmem:[#allocation2] sm:$0xff]  ;;  %v4476_v45 = vld [vmem:[#allocation5 + $0x1ac] sm:$0xf0]  ;;  %v3268_v47 = vor.u32 %v4481_v37, %v3265_v38  ;;  %v3225_v48 = vld [vmem:[#allocation5 + $0x1b0] sm:$0xf0]  ;;  %s4980_s10 = smov [#allocation13]  }
  0x37   :  { %574 = vmatpush.bf16.msra.mxu3 %v3092_v10  ;;  %v3231_v49 = vld [vmem:[#allocation5 + $0x198] sm:$0xf]  ;;  %v4473_v51 = vld [vmem:[#allocation5 + $0x19c] sm:$0xf]  ;;  %v3224_v53 = vor.u32 %v4476_v45, %v3223_v44  ;;  %v3228_v54 = vor.u32 %v4472_v46, %v3225_v48  ;;  %v3191_v56 = vld [vmem:[#allocation5 + $0x150] sm:$0xf] }
  0x38   :  { %v4477_v50 = vld [vmem:[#allocation5 + $0x1b4] sm:$0xf0]  ;;  %v3233_v52 = vld [vmem:[#allocation5 + $0x1b8] sm:$0xf0]  ;;  %v4468_v57 = vld [vmem:[#allocation5 + $0x16c] sm:$0xf0] }
  0x39   :  { %533 = vmatpush.bf16.msra.mxu0 %v3048_v16  ;;  %547 = vmatpush.bf16.msra.mxu1 %v3052_v19  ;;  %v3232_v55 = vor.u32 %v4477_v50, %v3231_v49  ;;  %v4464_v58 = vld [vmem:[#allocation5 + $0x154] sm:$0xf]  ;;  %v3236_v59 = vor.u32 %v4473_v51, %v3233_v52  ;;  %v3199_v61 = vld [vmem:[#allocation5 + $0x158] sm:$0xf]  ;;  %v4465_v63 = vld [vmem:[#allocation5 + $0x15c] sm:$0xf]  ;;  %v3192_v1 = vor.u32 %v4468_v57, %v3191_v56 }
  0x3a   :  { %561 = vmatpush.bf16.msra.mxu2 %v3056_v20  ;;  %v3193_v60 = vld [vmem:[#allocation5 + $0x170] sm:$0xf0]  ;;  %v4469_v62 = vld [vmem:[#allocation5 + $0x174] sm:$0xf0]  ;;  %v3201_v0 = vld [vmem:[#allocation5 + $0x178] sm:$0xf0] }
  0x3b   :  { %575 = vmatpush.bf16.msra.mxu3 %v3060_v24  ;;  %v3196_v2 = vor.u32 %v4464_v58, %v3193_v60  ;;  %v3200_v3 = vor.u32 %v4469_v62, %v3199_v61  ;;  %v3159_v4 = vld [vmem:[#allocation5 + $0x110] sm:$0xf]  ;;  %v4456_v6 = vld [vmem:[#allocation5 + $0x114] sm:$0xf]  ;;  %v3204_v7 = vor.u32 %v4465_v63, %v3201_v0  ;;  %v3167_v9 = vld [vmem:[#allocation5 + $0x118] sm:$0xf] }
  0x3c   :  { %v4460_v5 = vld [vmem:[#allocation5 + $0x12c] sm:$0xf0]  ;;  %v3161_v8 = vld [vmem:[#allocation5 + $0x130] sm:$0xf0]  ;;  %v4461_v10 = vld [vmem:[#allocation5 + $0x134] sm:$0xf0] }
  0x3d   :  { %534 = vmatpush.bf16.msra.mxu0 %v3016_v31  ;;  %548 = vmatpush.bf16.msra.mxu1 %v3020_v35  ;;  %v4457_v11 = vld [vmem:[#allocation5 + $0x11c] sm:$0xf]  ;;  %v3160_v13 = vor.u32 %v4460_v5, %v3159_v4  ;;  %v3164_v14 = vor.u32 %v4456_v6, %v3161_v8  ;;  %v3168_v15 = vor.u32 %v4461_v10, %v3167_v9  ;;  %v3127_v16 = vld [vmem:[#allocation5 + $0xd0] sm:$0xf]  ;;  %v4448_v18 = vld [vmem:[#allocation5 + $0xd4] sm:$0xf] }
  0x3e   :  { %562 = vmatpush.bf16.msra.mxu2 %v3024_v36  ;;  %v3169_v12 = vld [vmem:[#allocation5 + $0x138] sm:$0xf0]  ;;  %v4452_v17 = vld [vmem:[#allocation5 + $0xec] sm:$0xf0]  ;;  %v3129_v20 = vld [vmem:[#allocation5 + $0xf0] sm:$0xf0] }
  0x3f   :  { %576 = vmatpush.bf16.msra.mxu3 %v3028_v39  ;;  %v3172_v19 = vor.u32 %v4457_v11, %v3169_v12  ;;  %v3135_v21 = vld [vmem:[#allocation5 + $0xd8] sm:$0xf]  ;;  %v4449_v23 = vld [vmem:[#allocation5 + $0xdc] sm:$0xf]  ;;  %v3128_v25 = vor.u32 %v4452_v17, %v3127_v16  ;;  %v3132_v26 = vor.u32 %v4448_v18, %v3129_v20  ;;  %v3095_v28 = vld [vmem:[#allocation5 + $0x90] sm:$0xf] }
  0x40   :  { %535 = vmatmul.bf16.vlgmr.msra.gmra.mxu0 %v5041_v41  ;;  %549 = vmatmul.bf16.vlgmr.msra.gmra.mxu1 %v5041_v41  ;;  %v4453_v22 = vld [vmem:[#allocation5 + $0xf4] sm:$0xf0]  ;;  %v3137_v24 = vld [vmem:[#allocation5 + $0xf8] sm:$0xf0]  ;;  %v4444_v29 = vld [vmem:[#allocation5 + $0xac] sm:$0xf0] }
  0x41   :  { %583 = vmatpush.bf16.msrb.mxu0 %v3256_v40  ;;  %597 = vmatpush.bf16.msrb.mxu1 %v3260_v42  ;;  %v3136_v27 = vor.u32 %v4453_v22, %v3135_v21  ;;  %v4440_v30 = vld [vmem:[#allocation5 + $0x94] sm:$0xf]  ;;  %v3140_v31 = vor.u32 %v4449_v23, %v3137_v24  ;;  %v3103_v33 = vld [vmem:[#allocation5 + $0x98] sm:$0xf]  ;;  %v4441_v35 = vld [vmem:[#allocation5 + $0x9c] sm:$0xf]  ;;  %v3096_v37 = vor.u32 %v4444_v29, %v3095_v28 }
  0x42   :  { %611 = vmatpush.bf16.msrb.mxu2 %v3264_v43  ;;  %577 = vmatmul.bf16.vlgmr.msra.gmra.mxu3 %v5041_v41  ;;  %v3097_v32 = vld [vmem:[#allocation5 + $0xb0] sm:$0xf0]  ;;  %v4445_v34 = vld [vmem:[#allocation5 + $0xb4] sm:$0xf0]  ;;  %v3105_v36 = vld [vmem:[#allocation5 + $0xb8] sm:$0xf0] }
  0x43   :  { %625 = vmatpush.bf16.msrb.mxu3 %v3268_v47  ;;  %563 = vmatmul.bf16.vlgmr.msra.gmra.mxu2 %v5041_v41  ;;  %v3100_v38 = vor.u32 %v4440_v30, %v3097_v32  ;;  %v3104_v39 = vor.u32 %v4445_v34, %v3103_v33  ;;  %v3063_v40 = vld [vmem:[#allocation5 + $0x50] sm:$0xf]  ;;  %v4432_v43 = vld [vmem:[#allocation5 + $0x54] sm:$0xf]  ;;  %v3108_v44 = vor.u32 %v4441_v35, %v3105_v36  ;;  %v3071_v46 = vld [vmem:[#allocation5 + $0x58] sm:$0xf] }
  0x44   :  { %v4436_v42 = vld [vmem:[#allocation5 + $0x6c] sm:$0xf0]  ;;  %v3065_v45 = vld [vmem:[#allocation5 + $0x70] sm:$0xf0]  ;;  %v4437_v47 = vld [vmem:[#allocation5 + $0x74] sm:$0xf0] }
  0x45   :  { %584 = vmatpush.bf16.msrb.mxu0 %v3224_v53  ;;  %598 = vmatpush.bf16.msrb.mxu1 %v3228_v54  ;;  %v4433_v48 = vld [vmem:[#allocation5 + $0x5c] sm:$0xf]  ;;  %v3064_v50 = vor.u32 %v4436_v42, %v3063_v40  ;;  %v3031_v51 = vld [vmem:[#allocation5 + $0x10] sm:$0xf]  ;;  %v3068_v52 = vor.u32 %v4432_v43, %v3065_v45  ;;  %v3072_v53 = vor.u32 %v4437_v47, %v3071_v46  ;;  %v3033_v56 = vld [vmem:[#allocation5 + $0x30] sm:$0xf0] }
  0x46   :  { %612 = vmatpush.bf16.msrb.mxu2 %v3232_v55  ;;  %v3073_v49 = vld [vmem:[#allocation5 + $0x78] sm:$0xf0]  ;;  %v4428_v54 = vld [vmem:[#allocation5 + $0x2c] sm:$0xf0]  ;;  %v4424_v55 = vld [vmem:[#allocation5 + $0x14] sm:$0xf] }
  0x47   :  { %626 = vmatpush.bf16.msrb.mxu3 %v3236_v59  ;;  %v3076_v57 = vor.u32 %v4433_v48, %v3073_v49  ;;  %v3039_v58 = vld [vmem:[#allocation5 + $0x18] sm:$0xf]  ;;  %v4425_v60 = vld [vmem:[#allocation5 + $0x1c] sm:$0xf]  ;;  %v3383_v62 = vld [vmem:[#allocation8 + $0xe0] sm:$0xf]  ;;  %v3032_v0 = vor.u32 %v4428_v54, %v3031_v51 }
  0x48   :  { %v4429_v59 = vld [vmem:[#allocation5 + $0x34] sm:$0xf0]  ;;  %v3041_v61 = vld [vmem:[#allocation5 + $0x38] sm:$0xf0]  ;;  %v3639_v8 = vld [vmem:[#allocation8 + $0x2e0] sm:$0xf] }
  0x49   :  { %585 = vmatpush.bf16.msrb.mxu0 %v3192_v1  ;;  %599 = vmatpush.bf16.msrb.mxu1 %v3196_v2  ;;  %v4516_v63 = vld [vmem:[#allocation8 + $0xec] sm:$0xf0]  ;;  %v3511_v1 = vld [vmem:[#allocation8 + $0x1e0] sm:$0xf]  ;;  %v3040_v4 = vor.u32 %v4429_v59, %v3039_v58  ;;  %v3044_v5 = vor.u32 %v4425_v60, %v3041_v61  ;;  %s2991_s11 = sshll.u32 %s4980_s10, 4  ;;  %s2993_s14 = sshll.u32 %s5170_s7, 4  ;;  %s2992_s11 = int_to_ptr.vmem [resolvable:$true] %s2991_s11  ;;  %s2994_s14 = int_to_ptr.hbm [resolvable:$true] %s2993_s14 }
  0x4a   :  { %613 = vmatpush.bf16.msrb.mxu2 %v3200_v3  ;;  %v4548_v2 = vld [vmem:[#allocation8 + $0x1ec] sm:$0xf0]  ;;  %v3036_v3 = vor.u32 %v4424_v55, %v3033_v56  ;;  %v3384_v6 = vor.u32 %v4516_v63, %v3383_v62  ;;  %v3767_v12 = vld [vmem:[#allocation8 + $0x3e0] sm:$0xf]  ;;  %s4982_s1 = smov 8  }
  0x4b   :  { %627 = vmatpush.bf16.msrb.mxu3 %v3204_v7  ;;  %v3367_v7 = vld [vmem:[#allocation8 + $0xc0] sm:$0xf]  ;;  %v4580_v9 = vld [vmem:[#allocation8 + $0x2ec] sm:$0xf0]  ;;  %v3512_v10 = vor.u32 %v4548_v2, %v3511_v1 }
  0x4c   :  { %v4512_v11 = vld [vmem:[#allocation8 + $0xcc] sm:$0xf0]  ;;  %v3640_v16 = vor.u32 %v4580_v9, %v3639_v8  ;;  %v3623_v20 = vld [vmem:[#allocation8 + $0x2c0] sm:$0xf] }
  0x4d   :  { %586 = vmatpush.bf16.msrb.mxu0 %v3160_v13  ;;  %600 = vmatpush.bf16.msrb.mxu1 %v3164_v14  ;;  %v4612_v13 = vld [vmem:[#allocation8 + $0x3ec] sm:$0xf0]  ;;  %v3495_v14 = vld [vmem:[#allocation8 + $0x1c0] sm:$0xf]  ;;  %v3368_v17 = vor.u32 %v4512_v11, %v3367_v7 }
  0x4e   :  { %614 = vmatpush.bf16.msrb.mxu2 %v3168_v15  ;;  %v4544_v15 = vld [vmem:[#allocation8 + $0x1cc] sm:$0xf0]  ;;  %v3768_v18 = vor.u32 %v4612_v13, %v3767_v12  ;;  %v3751_v24 = vld [vmem:[#allocation8 + $0x3c0] sm:$0xf] }
  0x4f   :  { %628 = vmatpush.bf16.msrb.mxu3 %v3172_v19  ;;  %v3351_v19 = vld [vmem:[#allocation8 + $0xa0] sm:$0xf]  ;;  %v4576_v21 = vld [vmem:[#allocation8 + $0x2cc] sm:$0xf0]  ;;  %v3496_v22 = vor.u32 %v4544_v15, %v3495_v14 }
  0x50   :  { %v4508_v23 = vld [vmem:[#allocation8 + $0xac] sm:$0xf0]  ;;  %v3624_v28 = vor.u32 %v4576_v21, %v3623_v20  ;;  %v3607_v32 = vld [vmem:[#allocation8 + $0x2a0] sm:$0xf] }
  0x51   :  { %587 = vmatpush.bf16.msrb.mxu0 %v3128_v25  ;;  %601 = vmatpush.bf16.msrb.mxu1 %v3132_v26  ;;  %v4608_v25 = vld [vmem:[#allocation8 + $0x3cc] sm:$0xf0]  ;;  %v3479_v26 = vld [vmem:[#allocation8 + $0x1a0] sm:$0xf]  ;;  %v3352_v29 = vor.u32 %v4508_v23, %v3351_v19 }
  0x52   :  { %615 = vmatpush.bf16.msrb.mxu2 %v3136_v27  ;;  %v4540_v27 = vld [vmem:[#allocation8 + $0x1ac] sm:$0xf0]  ;;  %v3752_v30 = vor.u32 %v4608_v25, %v3751_v24  ;;  %v3735_v36 = vld [vmem:[#allocation8 + $0x3a0] sm:$0xf] }
  0x53   :  { %629 = vmatpush.bf16.msrb.mxu3 %v3140_v31  ;;  %v3335_v31 = vld [vmem:[#allocation8 + $0x80] sm:$0xf]  ;;  %v4572_v33 = vld [vmem:[#allocation8 + $0x2ac] sm:$0xf0]  ;;  %v3480_v34 = vor.u32 %v4540_v27, %v3479_v26 }
  0x54   :  { %v4504_v35 = vld [vmem:[#allocation8 + $0x8c] sm:$0xf0]  ;;  %v3608_v40 = vor.u32 %v4572_v33, %v3607_v32  ;;  %v3319_v42 = vld [vmem:[#allocation8 + $0x60] sm:$0xf] }
  0x55   :  { %588 = vmatpush.bf16.msrb.mxu0 %v3096_v37  ;;  %602 = vmatpush.bf16.msrb.mxu1 %v3100_v38  ;;  %v4604_v37 = vld [vmem:[#allocation8 + $0x3ac] sm:$0xf0]  ;;  %v3463_v38 = vld [vmem:[#allocation8 + $0x180] sm:$0xf] }
  0x56   :  { %616 = vmatpush.bf16.msrb.mxu2 %v3104_v39  ;;  %v4536_v39 = vld [vmem:[#allocation8 + $0x18c] sm:$0xf0]  ;;  %v3736_v43 = vor.u32 %v4604_v37, %v3735_v36  ;;  %v3719_v48 = vld [vmem:[#allocation8 + $0x380] sm:$0xf] }
  0x57   :  { %630 = vmatpush.bf16.msrb.mxu3 %v3108_v44  ;;  %v3591_v44 = vld [vmem:[#allocation8 + $0x280] sm:$0xf]  ;;  %v4568_v45 = vld [vmem:[#allocation8 + $0x28c] sm:$0xf0]  ;;  %v3464_v46 = vor.u32 %v4536_v39, %v3463_v38 }
  0x58   :  { %v4500_v47 = vld [vmem:[#allocation8 + $0x6c] sm:$0xf0]  ;;  %v3303_v55 = vld [vmem:[#allocation8 + $0x40] sm:$0xf] }
  0x59   :  { %589 = vmatpush.bf16.msrb.mxu0 %v3064_v50  ;;  %603 = vmatpush.bf16.msrb.mxu1 %v3068_v52  ;;  %v4600_v49 = vld [vmem:[#allocation8 + $0x38c] sm:$0xf0]  ;;  %v3447_v50 = vld [vmem:[#allocation8 + $0x160] sm:$0xf]  ;;  %v3592_v52 = vor.u32 %v4568_v45, %v3591_v44 }
  0x5a   :  { %617 = vmatpush.bf16.msrb.mxu2 %v3072_v53  ;;  %v4532_v51 = vld [vmem:[#allocation8 + $0x16c] sm:$0xf0]  ;;  %v3320_v53 = vor.u32 %v4500_v47, %v3319_v42  ;;  %v3720_v54 = vor.u32 %v4600_v49, %v3719_v48  ;;  %v3575_v56 = vld [vmem:[#allocation8 + $0x260] sm:$0xf] }
  0x5b   :  { %631 = vmatpush.bf16.msrb.mxu3 %v3076_v57  ;;  %v4564_v57 = vld [vmem:[#allocation8 + $0x26c] sm:$0xf0]  ;;  %v3448_v58 = vor.u32 %v4532_v51, %v3447_v50  ;;  %v3703_v60 = vld [vmem:[#allocation8 + $0x360] sm:$0xf] }
  0x5c   :  { %v4496_v59 = vld [vmem:[#allocation8 + $0x4c] sm:$0xf0]  ;;  %v3431_v62 = vld [vmem:[#allocation8 + $0x140] sm:$0xf] }
  0x5d   :  { %590 = vmatpush.bf16.msrb.mxu0 %v3032_v0  ;;  %604 = vmatpush.bf16.msrb.mxu1 %v3036_v3  ;;  %v4596_v61 = vld [vmem:[#allocation8 + $0x36c] sm:$0xf0]  ;;  %v3576_v0 = vor.u32 %v4564_v57, %v3575_v56  ;;  %v3304_v1 = vor.u32 %v4496_v59, %v3303_v55  ;;  %v3287_v3 = vld [vmem:[#allocation8 + $0x20] sm:$0xf] }
  0x5e   :  { %618 = vmatpush.bf16.msrb.mxu2 %v3040_v4  ;;  %v4528_v63 = vld [vmem:[#allocation8 + $0x14c] sm:$0xf0]  ;;  %v3704_v2 = vor.u32 %v4596_v61, %v3703_v60  ;;  %v3559_v4 = vld [vmem:[#allocation8 + $0x240] sm:$0xf] }
  0x5f   :  { %632 = vmatpush.bf16.msrb.mxu3 %v3044_v5  ;;  %v4560_v5 = vld [vmem:[#allocation8 + $0x24c] sm:$0xf0]  ;;  %v3687_v8 = vld [vmem:[#allocation8 + $0x340] sm:$0xf] }
  0x60   :  { %591 = vmatmul.bf16.vlgmr.msrb.gmra.mxu0 %v5041_v41  ;;  %605 = vmatmul.bf16.vlgmr.msrb.gmra.mxu1 %v5041_v41  ;;  %v4492_v7 = vld [vmem:[#allocation8 + $0x2c] sm:$0xf0]  ;;  %v3560_v12 = vor.u32 %v4560_v5, %v3559_v4  ;;  %v3271_v13 = vld [vmem:[#allocation8] sm:$0xf] }
  0x61   :  { %2209 = vmatpush.bf16.msra.mxu0 %v3384_v6  ;;  %2223 = vmatpush.bf16.msra.mxu1 %v3512_v10  ;;  %v3432_v6 = vor.u32 %v4528_v63, %v3431_v62  ;;  %v4592_v9 = vld [vmem:[#allocation8 + $0x34c] sm:$0xf0]  ;;  %v3415_v10 = vld [vmem:[#allocation8 + $0x120] sm:$0xf]  ;;  %v3288_v14 = vor.u32 %v4492_v7, %v3287_v3 }
  0x62   :  { %619 = vmatmul.bf16.vlgmr.msrb.gmra.mxu2 %v5041_v41  ;;  %633 = vmatmul.bf16.vlgmr.msrb.gmra.mxu3 %v5041_v41  ;;  %v3336_v41 = vor.u32 %v4504_v35, %v3335_v31  ;;  %v4524_v11 = vld [vmem:[#allocation8 + $0x12c] sm:$0xf0]  ;;  %v3688_v15 = vor.u32 %v4592_v9, %v3687_v8  ;;  %v3399_v20 = vld [vmem:[#allocation8 + $0x100] sm:$0xf] }
  0x63   :  { %2237 = vmatpush.bf16.msra.mxu2 %v3640_v16  ;;  %2251 = vmatpush.bf16.msra.mxu3 %v3768_v18  ;;  %v4488_v16 = vld [vmem:[#allocation8 + $0xc] sm:$0xf0]  ;;  %v3416_v19 = vor.u32 %v4524_v11, %v3415_v10  ;;  %v3671_v21 = vld [vmem:[#allocation8 + $0x320] sm:$0xf] }
  0x64   :  { %v4556_v18 = vld [vmem:[#allocation8 + $0x22c] sm:$0xf0]  ;;  %v3895_v24 = vld [vmem:[#allocation8 + $0x4e0] sm:$0xf] }
  0x65   :  { %2210 = vmatpush.bf16.msra.mxu0 %v3368_v17  ;;  %2224 = vmatpush.bf16.msra.mxu1 %v3496_v22  ;;  %v3543_v17 = vld [vmem:[#allocation8 + $0x220] sm:$0xf]  ;;  %v4588_v22 = vld [vmem:[#allocation8 + $0x32c] sm:$0xf0] }
  0x66   :  { %v4520_v23 = vld [vmem:[#allocation8 + $0x10c] sm:$0xf0]  ;;  %v4023_v26 = vld [vmem:[#allocation8 + $0x5e0] sm:$0xf] }
  0x67   :  { %2238 = vmatpush.bf16.msra.mxu2 %v3624_v28  ;;  %2252 = vmatpush.bf16.msra.mxu3 %v3752_v30  ;;  %v4644_v25 = vld [vmem:[#allocation8 + $0x4ec] sm:$0xf0]  ;;  %v3544_v28 = vor.u32 %v4556_v18, %v3543_v17  ;;  %v3672_v30 = vor.u32 %v4588_v22, %v3671_v21  ;;  %v3879_v31 = vld [vmem:[#allocation8 + $0x4c0] sm:$0xf]  ;;  %v3400_v35 = vor.u32 %v4520_v23, %v3399_v20 }
  0x68   :  { %v4676_v27 = vld [vmem:[#allocation8 + $0x5ec] sm:$0xf0]  ;;  %v3527_v32 = vld [vmem:[#allocation8 + $0x200] sm:$0xf]  ;;  %v3896_v36 = vor.u32 %v4644_v25, %v3895_v24 }
  0x69   :  { %2211 = vmatpush.bf16.msra.mxu0 %v3352_v29  ;;  %2225 = vmatpush.bf16.msra.mxu1 %v3480_v34  ;;  %v3272_v29 = vor.u32 %v4488_v16, %v3271_v13  ;;  %v4552_v33 = vld [vmem:[#allocation8 + $0x20c] sm:$0xf0]  ;;  %v3655_v34 = vld [vmem:[#allocation8 + $0x300] sm:$0xf] }
  0x6a   :  { %v4584_v37 = vld [vmem:[#allocation8 + $0x30c] sm:$0xf0]  ;;  %v4151_v38 = vld [vmem:[#allocation8 + $0x6e0] sm:$0xf] }
  0x6b   :  { %2239 = vmatpush.bf16.msra.mxu2 %v3608_v40  ;;  %2253 = vmatpush.bf16.msra.mxu3 %v3736_v43  ;;  %v4708_v39 = vld [vmem:[#allocation8 + $0x6ec] sm:$0xf0]  ;;  %v4024_v40 = vor.u32 %v4676_v27, %v4023_v26  ;;  %v4007_v44 = vld [vmem:[#allocation8 + $0x5c0] sm:$0xf]  ;;  %v3656_v47 = vor.u32 %v4584_v37, %v3655_v34 }
  0x6c   :  { %v4640_v42 = vld [vmem:[#allocation8 + $0x4cc] sm:$0xf0]  ;;  %v4152_v48 = vor.u32 %v4708_v39, %v4151_v38  ;;  %v3863_v51 = vld [vmem:[#allocation8 + $0x4a0] sm:$0xf] }
  0x6d   :  { %2212 = vmatpush.bf16.msra.mxu0 %v3336_v41  ;;  %2226 = vmatpush.bf16.msra.mxu1 %v3464_v46  ;;  %v4279_v41 = vld [vmem:[#allocation8 + $0x7e0] sm:$0xf]  ;;  %v4740_v43 = vld [vmem:[#allocation8 + $0x7ec] sm:$0xf0]  ;;  %v3528_v46 = vor.u32 %v4552_v33, %v3527_v32  ;;  %v3880_v49 = vor.u32 %v4640_v42, %v3879_v31 }
  0x6e   :  { %v4672_v45 = vld [vmem:[#allocation8 + $0x5cc] sm:$0xf0]  ;;  %v4280_v50 = vor.u32 %v4740_v43, %v4279_v41  ;;  %v4263_v56 = vld [vmem:[#allocation8 + $0x7c0] sm:$0xf] }
  0x6f   :  { %2240 = vmatpush.bf16.msra.mxu2 %v3592_v52  ;;  %2254 = vmatpush.bf16.msra.mxu3 %v3720_v54  ;;  %v4135_v52 = vld [vmem:[#allocation8 + $0x6c0] sm:$0xf]  ;;  %v4008_v54 = vor.u32 %v4672_v45, %v4007_v44  ;;  %v4636_v55 = vld [vmem:[#allocation8 + $0x4ac] sm:$0xf0] }
  0x70   :  { %v4736_v57 = vld [vmem:[#allocation8 + $0x7cc] sm:$0xf0]  ;;  %v3864_v61 = vor.u32 %v4636_v55, %v3863_v51  ;;  %v4247_v8 = vld [vmem:[#allocation8 + $0x7a0] sm:$0xf] }
  0x71   :  { %2213 = vmatpush.bf16.msra.mxu0 %v3320_v53  ;;  %2227 = vmatpush.bf16.msra.mxu1 %v3448_v58  ;;  %v4704_v53 = vld [vmem:[#allocation8 + $0x6cc] sm:$0xf0]  ;;  %v3991_v58 = vld [vmem:[#allocation8 + $0x5a0] sm:$0xf]  ;;  %v4264_v62 = vor.u32 %v4736_v57, %v4263_v56 }
  0x72   :  { %v4668_v59 = vld [vmem:[#allocation8 + $0x5ac] sm:$0xf0]  ;;  %v4136_v60 = vor.u32 %v4704_v53, %v4135_v52  ;;  %v4103_v18 = vld [vmem:[#allocation8 + $0x680] sm:$0xf] }
  0x73   :  { %2241 = vmatpush.bf16.msra.mxu2 %v3576_v0  ;;  %2255 = vmatpush.bf16.msra.mxu3 %v3704_v2  ;;  %v3992_v63 = vor.u32 %v4668_v59, %v3991_v58  ;;  %v3847_v0 = vld [vmem:[#allocation8 + $0x480] sm:$0xf]  ;;  %v4664_v3 = vld [vmem:[#allocation8 + $0x58c] sm:$0xf0] }
  0x74   :  { %v3975_v2 = vld [vmem:[#allocation8 + $0x580] sm:$0xf]  ;;  %v4700_v7 = vld [vmem:[#allocation8 + $0x6ac] sm:$0xf0] }
  0x75   :  { %2214 = vmatpush.bf16.msra.mxu0 %v3304_v1  ;;  %2228 = vmatpush.bf16.msra.mxu1 %v3432_v6  ;;  %v4632_v1 = vld [vmem:[#allocation8 + $0x48c] sm:$0xf0]  ;;  %v3976_v5 = vor.u32 %v4664_v3, %v3975_v2  ;;  %v4119_v6 = vld [vmem:[#allocation8 + $0x6a0] sm:$0xf]  ;;  %v5051_v2 = vld [vmem:[#allocation7] sm:$0xff] }
  0x76   :  { %v3848_v4 = vor.u32 %v4632_v1, %v3847_v0  ;;  %v4120_v9 = vor.u32 %v4700_v7, %v4119_v6  ;;  %v4732_v10 = vld [vmem:[#allocation8 + $0x7ac] sm:$0xf0]  ;;  %v4231_v21 = vld [vmem:[#allocation8 + $0x780] sm:$0xf]  ;;  %v186_v6 = vperm.slane %v5051_v2, 1 }
  0x77   :  { %2242 = vmatpush.bf16.msra.mxu2 %v3560_v12  ;;  %2256 = vmatpush.bf16.msra.mxu3 %v3688_v15  ;;  %v4248_v11 = vor.u32 %v4732_v10, %v4247_v8  ;;  %v3831_v12 = vld [vmem:[#allocation8 + $0x460] sm:$0xf]  ;;  %v4628_v13 = vld [vmem:[#allocation8 + $0x46c] sm:$0xf0] }
  0x78   :  { %v3832_v15 = vor.u32 %v4628_v13, %v3831_v12  ;;  %v4660_v16 = vld [vmem:[#allocation8 + $0x56c] sm:$0xf0]  ;;  %v3815_v24 = vld [vmem:[#allocation8 + $0x440] sm:$0xf] }
  0x79   :  { %2215 = vmatpush.bf16.msra.mxu0 %v3288_v14  ;;  %2229 = vmatpush.bf16.msra.mxu1 %v3416_v19  ;;  %v3959_v14 = vld [vmem:[#allocation8 + $0x560] sm:$0xf]  ;;  %v4696_v19 = vld [vmem:[#allocation8 + $0x68c] sm:$0xf0] }
  0x7a   :  { %v3960_v17 = vor.u32 %v4660_v16, %v3959_v14  ;;  %v4104_v20 = vor.u32 %v4696_v19, %v4103_v18  ;;  %v4728_v22 = vld [vmem:[#allocation8 + $0x78c] sm:$0xf0]  ;;  %v3943_v26 = vld [vmem:[#allocation8 + $0x540] sm:$0xf]  ;;  %v3385_v16 = vld [vmem:[#allocation8 + $0xf0] sm:$0xf0] }
  0x7b   :  { %2243 = vmatpush.bf16.msra.mxu2 %v3544_v28  ;;  %2257 = vmatpush.bf16.msra.mxu3 %v3672_v30  ;;  %v4232_v23 = vor.u32 %v4728_v22, %v4231_v21  ;;  %v4624_v25 = vld [vmem:[#allocation8 + $0x44c] sm:$0xf0]  ;;  %v4087_v30 = vld [vmem:[#allocation8 + $0x660] sm:$0xf]  ;;  %v187_v18 = vperm.slane %v5051_v2, 2  ;;  %v188_v22 = vperm.slane %v5051_v2, 3 }
  0x7c   :  { %v3816_v27 = vor.u32 %v4624_v25, %v3815_v24  ;;  %v4656_v28 = vld [vmem:[#allocation8 + $0x54c] sm:$0xf0]  ;;  %v4215_v32 = vld [vmem:[#allocation8 + $0x760] sm:$0xf]  ;;  %v3513_v21 = vld [vmem:[#allocation8 + $0x1f0] sm:$0xf0] }
  0x7d   :  { %2216 = vmatpush.bf16.msra.mxu0 %v3272_v29  ;;  %2230 = vmatpush.bf16.msra.mxu1 %v3400_v35  ;;  %v3944_v29 = vor.u32 %v4656_v28, %v3943_v26  ;;  %v4692_v31 = vld [vmem:[#allocation8 + $0x66c] sm:$0xf0]  ;;  %v3927_v39 = vld [vmem:[#allocation8 + $0x520] sm:$0xf]  ;;  %v4510_v28 = vld [vmem:[#allocation8 + $0xc4] sm:$0xf] }
  0x7e   :  { %v4088_v33 = vor.u32 %v4692_v31, %v4087_v30  ;;  %v4724_v34 = vld [vmem:[#allocation8 + $0x76c] sm:$0xf0]  ;;  %v4071_v41 = vld [vmem:[#allocation8 + $0x640] sm:$0xf] }
  0x7f   :  { %2244 = vmatpush.bf16.msra.mxu2 %v3528_v46  ;;  %2258 = vmatpush.bf16.msra.mxu3 %v3656_v47  ;;  %v4216_v35 = vor.u32 %v4724_v34, %v4215_v32  ;;  %v4620_v37 = vld [vmem:[#allocation8 + $0x42c] sm:$0xf0]  ;;  %v4199_v44 = vld [vmem:[#allocation8 + $0x740] sm:$0xf]  ;;  %v4542_v32 = vld [vmem:[#allocation8 + $0x1c4] sm:$0xf] }
  0x80   :  { %v4688_v43 = vld [vmem:[#allocation8 + $0x64c] sm:$0xf0]  ;;  %v4183_v56 = vld [vmem:[#allocation8 + $0x720] sm:$0xf] }
  0x81   :  { %2265 = vmatpush.bf16.msrb.mxu0 %v3896_v36  ;;  %2279 = vmatpush.bf16.msrb.mxu1 %v4024_v40  ;;  %v3799_v36 = vld [vmem:[#allocation8 + $0x420] sm:$0xf]  ;;  %v4652_v40 = vld [vmem:[#allocation8 + $0x52c] sm:$0xf0]  ;;  %v4072_v45 = vor.u32 %v4688_v43, %v4071_v41 }
  0x82   :  { %v3800_v38 = vor.u32 %v4620_v37, %v3799_v36  ;;  %v3928_v42 = vor.u32 %v4652_v40, %v3927_v39  ;;  %v4720_v46 = vld [vmem:[#allocation8 + $0x74c] sm:$0xf0]  ;;  %v4578_v39 = vld [vmem:[#allocation8 + $0x2e4] sm:$0xf]  ;;  %v3641_v40 = vld [vmem:[#allocation8 + $0x2f0] sm:$0xf0] }
  0x83   :  { %2293 = vmatpush.bf16.msrb.mxu2 %v4152_v48  ;;  %2307 = vmatpush.bf16.msrb.mxu3 %v4280_v50  ;;  %v4200_v47 = vor.u32 %v4720_v46, %v4199_v44  ;;  %v3783_v48 = vld [vmem:[#allocation8 + $0x400] sm:$0xf]  ;;  %v4648_v52 = vld [vmem:[#allocation8 + $0x50c] sm:$0xf0]  ;;  %v3769_v44 = vld [vmem:[#allocation8 + $0x3f0] sm:$0xf0] }
  0x84   :  { %v3911_v50 = vld [vmem:[#allocation8 + $0x500] sm:$0xf]  ;;  %v4684_v55 = vld [vmem:[#allocation8 + $0x62c] sm:$0xf0]  ;;  %v3353_v46 = vld [vmem:[#allocation8 + $0xb0] sm:$0xf0] }
  0x85   :  { %2266 = vmatpush.bf16.msrb.mxu0 %v3880_v49  ;;  %2280 = vmatpush.bf16.msrb.mxu1 %v4008_v54  ;;  %v4616_v49 = vld [vmem:[#allocation8 + $0x40c] sm:$0xf0]  ;;  %v3912_v53 = vor.u32 %v4648_v52, %v3911_v50  ;;  %v4055_v54 = vld [vmem:[#allocation8 + $0x620] sm:$0xf]  ;;  %v3481_v50 = vld [vmem:[#allocation8 + $0x1b0] sm:$0xf0] }
  0x86   :  { %v3784_v51 = vor.u32 %v4616_v49, %v3783_v48  ;;  %v4716_v57 = vld [vmem:[#allocation8 + $0x72c] sm:$0xf0]  ;;  %v4056_v58 = vor.u32 %v4684_v55, %v4055_v54  ;;  %v4538_v49 = vld [vmem:[#allocation8 + $0x1a4] sm:$0xf] }
  0x87   :  { %2294 = vmatpush.bf16.msrb.mxu2 %v4136_v60  ;;  %2308 = vmatpush.bf16.msrb.mxu3 %v4264_v62  ;;  %v4184_v59 = vor.u32 %v4716_v57, %v4183_v56  ;;  %v4039_v60 = vld [vmem:[#allocation8 + $0x600] sm:$0xf]  ;;  %v4712_v0 = vld [vmem:[#allocation8 + $0x70c] sm:$0xf0]  ;;  %v4574_v57 = vld [vmem:[#allocation8 + $0x2c4] sm:$0xf] }
  0x89   :  { %2267 = vmatpush.bf16.msrb.mxu0 %v3864_v61  ;;  %2281 = vmatpush.bf16.msrb.mxu1 %v3992_v63  ;;  %v4680_v61 = vld [vmem:[#allocation8 + $0x60c] sm:$0xf0]  ;;  %v4167_v63 = vld [vmem:[#allocation8 + $0x700] sm:$0xf] }
  0x8a   :  { %v4040_v62 = vor.u32 %v4680_v61, %v4039_v60  ;;  %v4168_v1 = vor.u32 %v4712_v0, %v4167_v63  ;;  %v3484_v61 = vor.u32 %v4538_v49, %v3481_v50  ;;  %v4502_v63 = vld [vmem:[#allocation8 + $0x84] sm:$0xf]  ;;  %v3337_v0 = vld [vmem:[#allocation8 + $0x90] sm:$0xf0] }
  0x8b   :  { %2295 = vmatpush.bf16.msrb.mxu2 %v4120_v9  ;;  %2309 = vmatpush.bf16.msrb.mxu3 %v4248_v11  ;;  %v4558_v49 = vld [vmem:[#allocation8 + $0x244] sm:$0xf]  ;;  %v3561_v50 = vld [vmem:[#allocation8 + $0x250] sm:$0xf0] }
  0x8d   :  { %2268 = vmatpush.bf16.msrb.mxu0 %v3848_v4  ;;  %2282 = vmatpush.bf16.msrb.mxu1 %v3976_v5  ;;  %v185_v4 = vperm.slane %v5051_v2, 0 }
  0x8f   :  { %2296 = vmatpush.bf16.msrb.mxu2 %v4104_v20  ;;  %2310 = vmatpush.bf16.msrb.mxu3 %v4232_v23  ;;  %v4546_v20 = vld [vmem:[#allocation8 + $0x1e4] sm:$0xf] }
  0x91   :  { %2269 = vmatpush.bf16.msrb.mxu0 %v3832_v15  ;;  %2283 = vmatpush.bf16.msrb.mxu1 %v3960_v17  ;;  %v4514_v15 = vld [vmem:[#allocation8 + $0xe4] sm:$0xf] }
  0x92   :  { %v3388_v25 = vor.u32 %v4514_v15, %v3385_v16  ;;  %v3449_v15 = vld [vmem:[#allocation8 + $0x170] sm:$0xf0] }
  0x93   :  { %2297 = vmatpush.bf16.msrb.mxu2 %v4088_v33  ;;  %2311 = vmatpush.bf16.msrb.mxu3 %v4216_v35  ;;  %v3497_v33 = vld [vmem:[#allocation8 + $0x1d0] sm:$0xf0] }
  0x94   :  { %v3500_v43 = vor.u32 %v4542_v32, %v3497_v33  ;;  %v3433_v32 = vld [vmem:[#allocation8 + $0x150] sm:$0xf0]  ;;  %v190_v33 = vperm.slane %v5051_v2, 5 }
  0x95   :  { %2270 = vmatpush.bf16.msrb.mxu0 %v3816_v27  ;;  %2284 = vmatpush.bf16.msrb.mxu1 %v3944_v29  ;;  %v3516_v27 = vor.u32 %v4546_v20, %v3513_v21  ;;  %v3369_v29 = vld [vmem:[#allocation8 + $0xd0] sm:$0xf0]  ;;  %v4598_v21 = vld [vmem:[#allocation8 + $0x384] sm:$0xf] }
  0x96   :  { %v3593_v20 = vld [vmem:[#allocation8 + $0x290] sm:$0xf0] }
  0x97   :  { %2298 = vmatpush.bf16.msrb.mxu2 %v4072_v45  ;;  %2312 = vmatpush.bf16.msrb.mxu3 %v4200_v47  ;;  %v4506_v45 = vld [vmem:[#allocation8 + $0xa4] sm:$0xf] }
  0x98   :  { %v3356_v56 = vor.u32 %v4506_v45, %v3353_v46  ;;  %v4522_v45 = vld [vmem:[#allocation8 + $0x124] sm:$0xf]  ;;  %v3417_v46 = vld [vmem:[#allocation8 + $0x130] sm:$0xf0] }
  0x99   :  { %2271 = vmatpush.bf16.msrb.mxu0 %v3800_v38  ;;  %2285 = vmatpush.bf16.msrb.mxu1 %v3928_v42  ;;  %v3372_v38 = vor.u32 %v4510_v28, %v3369_v29  ;;  %v4610_v42 = vld [vmem:[#allocation8 + $0x3e4] sm:$0xf]  ;;  %v189_v28 = vperm.slane %v5051_v2, 4 }
  0x9a   :  { %v3772_v55 = vor.u32 %v4610_v42, %v3769_v44  ;;  %v3705_v42 = vld [vmem:[#allocation8 + $0x370] sm:$0xf0] }
  0x9b   :  { %2299 = vmatpush.bf16.msrb.mxu2 %v4056_v58  ;;  %2313 = vmatpush.bf16.msrb.mxu3 %v4184_v59  ;;  %v3625_v58 = vld [vmem:[#allocation8 + $0x2d0] sm:$0xf0]  ;;  %v4606_v59 = vld [vmem:[#allocation8 + $0x3c4] sm:$0xf] }
  0x9d   :  { %2272 = vmatpush.bf16.msrb.mxu0 %v3784_v51  ;;  %2286 = vmatpush.bf16.msrb.mxu1 %v3912_v53  ;;  %v3644_v53 = vor.u32 %v4578_v39, %v3641_v40  ;;  %v4594_v39 = vld [vmem:[#allocation8 + $0x364] sm:$0xf] }
  0x9f   :  { %2300 = vmatpush.bf16.msrb.mxu2 %v4040_v62  ;;  %2314 = vmatpush.bf16.msrb.mxu3 %v4168_v1  ;;  %v3753_v62 = vld [vmem:[#allocation8 + $0x3d0] sm:$0xf0]  ;;  %v4534_v1 = vld [vmem:[#allocation8 + $0x184] sm:$0xf] }
  0xbd   :  { %v536_v3 = vpop.f32.mrf.mxu0  ;;  %v550_v5 = vpop.f32.mrf.mxu1 }
  0xbe   :  { %v537_v7 = vadd.f32 %v536_v3, %v185_v4  ;;  %v551_v8 = vadd.f32 %v550_v5, %v186_v6  ;;  %v3465_v3 = vld [vmem:[#allocation8 + $0x190] sm:$0xf0]  ;;  %v3756_v5 = vor.u32 %v4606_v59, %v3753_v62 }
  0xbf   :  { %v3273_v62 = vld [vmem:[#allocation8 + $0x10] sm:$0xf0] }
  0xc0   :  { %v639_v12 = vmax.f32 %v537_v7, 0.0  ;;  %v640_v17 = vmax.f32 %v551_v8, 0.0  ;;  %v4570_v7 = vld [vmem:[#allocation8 + $0x2a4] sm:$0xf]  ;;  %v3609_v8 = vld [vmem:[#allocation8 + $0x2b0] sm:$0xf0] }
  0xc1   :  { %v3612_v16 = vor.u32 %v4570_v7, %v3609_v8  ;;  %v191_v8 = vperm.slane %v5051_v2, 6 }
  0xc5   :  { %v578_v10 = vpop.f32.mrf.mxu3  ;;  %v538_v11 = vpop.f32.mrf.mxu0 }
  0xc6   :  { %v564_v9 = vpop.f32.mrf.mxu2  ;;  %v539_v13 = vadd.f32 %v538_v11, %v185_v4  ;;  %v552_v14 = vpop.f32.mrf.mxu1  ;;  %v579_v34 = vadd.f32 %v578_v10, %v188_v22  ;;  %v3628_v4 = vor.u32 %v4574_v57, %v3625_v58  ;;  %v3468_v10 = vor.u32 %v4534_v1, %v3465_v3  ;;  %v3737_v11 = vld [vmem:[#allocation8 + $0x3b0] sm:$0xf0]  ;;  %v4486_v57 = vld [vmem:[#allocation8 + $0x4] sm:$0xf] }
  0xc7   :  { %v553_v19 = vadd.f32 %v552_v14, %v186_v6  ;;  %v565_v30 = vadd.f32 %v564_v9, %v187_v18  ;;  %v3340_v6 = vor.u32 %v4502_v63, %v3337_v0  ;;  %v4602_v9 = vld [vmem:[#allocation8 + $0x3a4] sm:$0xf]  ;;  %v3401_v0 = vld [vmem:[#allocation8 + $0x110] sm:$0xf0] }
  0xc8   :  { %v647_v23 = vmax.f32 %v539_v13, 0.0  ;;  %v642_v51 = vmax.f32 %v579_v34, 0.0  ;;  %v3321_v13 = vld [vmem:[#allocation8 + $0x70] sm:$0xf0]  ;;  %v4530_v14 = vld [vmem:[#allocation8 + $0x164] sm:$0xf] }
  0xc9   :  { %v648_v24 = vmax.f32 %v553_v19, 0.0  ;;  %v641_v47 = vmax.f32 %v565_v30, 0.0  ;;  %v4566_v19 = vld [vmem:[#allocation8 + $0x284] sm:$0xf] }
  0xca   :  { %v5057_v26 = vpack.c.bf16 %v647_v23, %v639_v12  ;;  %v4498_v12 = vld [vmem:[#allocation8 + $0x64] sm:$0xf]  ;;  %v3452_v23 = vor.u32 %v4530_v14, %v3449_v15  ;;  %v3596_v34 = vor.u32 %v4566_v19, %v3593_v20 }
  0xcb   :  { %v5059_v31 = vpack.c.bf16 %v648_v24, %v640_v17  ;;  %v3740_v17 = vor.u32 %v4602_v9, %v3737_v11  ;;  %v3721_v24 = vld [vmem:[#allocation8 + $0x390] sm:$0xf0]  ;;  %v4526_v30 = vld [vmem:[#allocation8 + $0x144] sm:$0xf] }
  0xcc   :  { %2217 = vmatmul.bf16.vlgmr.msra.gmra.mxu0 %v5057_v26  ;;  %v3436_v40 = vor.u32 %v4526_v30, %v3433_v32  ;;  %v4518_v63 = vld [vmem:[#allocation8 + $0x104] sm:$0xf]  ;;  %v3881_v30 = vld [vmem:[#allocation8 + $0x4d0] sm:$0xf0] }
  0xcd   :  { %v580_v37 = vpop.f32.mrf.mxu3  ;;  %2231 = vmatmul.bf16.vlgmr.msra.gmra.mxu1 %v5059_v31  ;;  %2321 = vmatpush.bf16.msra.mxu0 %v3388_v25  ;;  %v4494_v25 = vld [vmem:[#allocation8 + $0x44] sm:$0xf]  ;;  %v3404_v20 = vor.u32 %v4518_v63, %v3401_v0 }
  0xce   :  { %v566_v35 = vpop.f32.mrf.mxu2  ;;  %v581_v41 = vadd.f32 %v580_v37, %v188_v22  ;;  %2335 = vmatpush.bf16.msra.mxu1 %v3516_v27  ;;  %v3305_v27 = vld [vmem:[#allocation8 + $0x50] sm:$0xf0]  ;;  %v4562_v37 = vld [vmem:[#allocation8 + $0x264] sm:$0xf] }
  0xcf   :  { %v567_v36 = vadd.f32 %v566_v35, %v187_v18  ;;  %v3324_v18 = vor.u32 %v4498_v12, %v3321_v13  ;;  %v3724_v35 = vor.u32 %v4598_v21, %v3721_v24  ;;  %v4674_v11 = vld [vmem:[#allocation8 + $0x5e4] sm:$0xf]  ;;  %v4025_v12 = vld [vmem:[#allocation8 + $0x5f0] sm:$0xf0]  ;;  %v192_v13 = vperm.slane %v5051_v2, 7 }
  0xd0   :  { %v650_v52 = vmax.f32 %v581_v41, 0.0  ;;  %v4490_v41 = vld [vmem:[#allocation8 + $0x24] sm:$0xf]  ;;  %v4028_v2 = vor.u32 %v4674_v11, %v4025_v12  ;;  %v3977_v12 = vld [vmem:[#allocation8 + $0x590] sm:$0xf0] }
  0xd1   :  { %v649_v48 = vmax.f32 %v567_v36, 0.0  ;;  %2322 = vmatpush.bf16.msra.mxu0 %v3372_v38  ;;  %v3308_v36 = vor.u32 %v4494_v25, %v3305_v27  ;;  %v3577_v38 = vld [vmem:[#allocation8 + $0x270] sm:$0xf0]  ;;  %v4586_v21 = vld [vmem:[#allocation8 + $0x324] sm:$0xf] }
  0xd2   :  { %v5065_v60 = vpack.c.bf16 %v650_v52, %v642_v51  ;;  %2336 = vmatpush.bf16.msra.mxu1 %v3500_v43  ;;  %v3289_v43 = vld [vmem:[#allocation8 + $0x30] sm:$0xf0]  ;;  %v3708_v52 = vor.u32 %v4594_v39, %v3705_v42  ;;  %v4670_v32 = vld [vmem:[#allocation8 + $0x5c4] sm:$0xf] }
  0xd3   :  { %v5063_v54 = vpack.c.bf16 %v649_v48, %v641_v47  ;;  %v3580_v48 = vor.u32 %v4562_v37, %v3577_v38  ;;  %v4550_v37 = vld [vmem:[#allocation8 + $0x204] sm:$0xf]  ;;  %v3529_v38 = vld [vmem:[#allocation8 + $0x210] sm:$0xf0] }
  0xd4   :  { %2259 = vmatmul.bf16.vlgmr.msra.gmra.mxu3 %v5065_v60  ;;  %v4582_v42 = vld [vmem:[#allocation8 + $0x304] sm:$0xf] }
  0xd5   :  { %2245 = vmatmul.bf16.vlgmr.msra.gmra.mxu2 %v5063_v54  ;;  %2363 = vmatpush.bf16.msra.mxu3 %v3772_v55  ;;  %v4590_v55 = vld [vmem:[#allocation8 + $0x344] sm:$0xf] }
  0xd6   :  { %2349 = vmatpush.bf16.msra.mxu2 %v3644_v53  ;;  %2323 = vmatpush.bf16.msra.mxu0 %v3356_v56  ;;  %v3292_v53 = vor.u32 %v4490_v41, %v3289_v43  ;;  %v3689_v56 = vld [vmem:[#allocation8 + $0x350] sm:$0xf0]  ;;  %v4706_v43 = vld [vmem:[#allocation8 + $0x6e4] sm:$0xf] }
  0xd7   :  { %2337 = vmatpush.bf16.msra.mxu1 %v3484_v61  ;;  %v3420_v61 = vor.u32 %v4522_v45, %v3417_v46  ;;  %v3692_v15 = vor.u32 %v4590_v55, %v3689_v56  ;;  %v3657_v41 = vld [vmem:[#allocation8 + $0x310] sm:$0xf0]  ;;  %v4662_v11 = vld [vmem:[#allocation8 + $0x584] sm:$0xf] }
  0xd8   :  { %v4153_v46 = vld [vmem:[#allocation8 + $0x6f0] sm:$0xf0] }
  0xd9   :  { %2364 = vmatpush.bf16.msra.mxu3 %v3756_v5  ;;  %v4642_v5 = vld [vmem:[#allocation8 + $0x4e4] sm:$0xf]  ;;  %v3865_v55 = vld [vmem:[#allocation8 + $0x4b0] sm:$0xf0]  ;;  %v4156_v63 = vor.u32 %v4706_v43, %v4153_v46 }
  0xda   :  { %2350 = vmatpush.bf16.msra.mxu2 %v3628_v4  ;;  %2324 = vmatpush.bf16.msra.mxu0 %v3340_v6  ;;  %v3897_v6 = vld [vmem:[#allocation8 + $0x4f0] sm:$0xf0]  ;;  %v4722_v46 = vld [vmem:[#allocation8 + $0x764] sm:$0xf] }
  0xdb   :  { %2338 = vmatpush.bf16.msra.mxu1 %v3468_v10  ;;  %v3564_v10 = vor.u32 %v4558_v49, %v3561_v50  ;;  %v3900_v24 = vor.u32 %v4642_v5, %v3897_v6  ;;  %v4137_v5 = vld [vmem:[#allocation8 + $0x6d0] sm:$0xf0]  ;;  %v4734_v6 = vld [vmem:[#allocation8 + $0x7c4] sm:$0xf] }
  0xdc   :  { %v4089_v43 = vld [vmem:[#allocation8 + $0x670] sm:$0xf0] }
  0xdd   :  { %v592_v22 = vpop.f32.mrf.mxu0  ;;  %v606_v29 = vpop.f32.mrf.mxu1  ;;  %2365 = vmatpush.bf16.msra.mxu3 %v3740_v17  ;;  %v4554_v17 = vld [vmem:[#allocation8 + $0x224] sm:$0xf] }
  0xde   :  { %2351 = vmatpush.bf16.msra.mxu2 %v3612_v16  ;;  %2325 = vmatpush.bf16.msra.mxu0 %v3324_v18  ;;  %v593_v44 = vadd.f32 %v592_v22, %v189_v28  ;;  %v607_v47 = vadd.f32 %v606_v29, %v190_v33  ;;  %v3276_v16 = vor.u32 %v4486_v57, %v3273_v62  ;;  %v3545_v18 = vld [vmem:[#allocation8 + $0x230] sm:$0xf0]  ;;  %v4638_v29 = vld [vmem:[#allocation8 + $0x4c4] sm:$0xf] }
  0xdf   :  { %2339 = vmatpush.bf16.msra.mxu1 %v3452_v23  ;;  %v3673_v22 = vld [vmem:[#allocation8 + $0x330] sm:$0xf0]  ;;  %v3884_v45 = vor.u32 %v4638_v29, %v3881_v30  ;;  %v4694_v29 = vld [vmem:[#allocation8 + $0x684] sm:$0xf] }
  0xe0   :  { %v643_v1 = vmax.f32 %v593_v44, 0.0  ;;  %v644_v7 = vmax.f32 %v607_v47, 0.0  ;;  %v4738_v47 = vld [vmem:[#allocation8 + $0x7e4] sm:$0xf]  ;;  %v4105_v30 = vld [vmem:[#allocation8 + $0x690] sm:$0xf0] }
  0xe1   :  { %2366 = vmatpush.bf16.msra.mxu3 %v3724_v35  ;;  %v3676_v35 = vor.u32 %v4586_v21, %v3673_v22  ;;  %v4626_v21 = vld [vmem:[#allocation8 + $0x464] sm:$0xf]  ;;  %v3833_v22 = vld [vmem:[#allocation8 + $0x470] sm:$0xf0] }
  0xe2   :  { %2352 = vmatpush.bf16.msra.mxu2 %v3596_v34  ;;  %2326 = vmatpush.bf16.msra.mxu0 %v3308_v36  ;;  %v4009_v36 = vld [vmem:[#allocation8 + $0x5d0] sm:$0xf0] }
  0xe3   :  { %2340 = vmatpush.bf16.msra.mxu1 %v3436_v40 }
  0xe5   :  { %v620_v51 = vpop.f32.mrf.mxu2  ;;  %v634_v58 = vpop.f32.mrf.mxu3  ;;  %2367 = vmatpush.bf16.msra.mxu3 %v3708_v52  ;;  %v3532_v52 = vor.u32 %v4550_v37, %v3529_v38  ;;  %v3817_v37 = vld [vmem:[#allocation8 + $0x450] sm:$0xf0]  ;;  %v4654_v38 = vld [vmem:[#allocation8 + $0x544] sm:$0xf] }
  0xe6   :  { %v594_v59 = vpop.f32.mrf.mxu0  ;;  %v608_v4 = vpop.f32.mrf.mxu1  ;;  %2353 = vmatpush.bf16.msra.mxu2 %v3580_v48  ;;  %2327 = vmatpush.bf16.msra.mxu0 %v3292_v53  ;;  %v621_v25 = vadd.f32 %v620_v51, %v191_v8  ;;  %v4281_v48 = vld [vmem:[#allocation8 + $0x7f0] sm:$0xf0]  ;;  %v4012_v51 = vor.u32 %v4670_v32, %v4009_v36  ;;  %v4634_v53 = vld [vmem:[#allocation8 + $0x4a4] sm:$0xf]  ;;  %v3836_v32 = vor.u32 %v4626_v21, %v3833_v22  ;;  %v4513_v21 = vld [vmem:[#allocation8 + $0xd4] sm:$0xf0] }
  0xe7   :  { %v595_v3 = vadd.f32 %v594_v59, %v189_v28  ;;  %v609_v9 = vadd.f32 %v608_v4, %v190_v33  ;;  %2341 = vmatpush.bf16.msra.mxu1 %v3420_v61  ;;  %v3548_v28 = vor.u32 %v4554_v17, %v3545_v18  ;;  %v635_v33 = vadd.f32 %v634_v58, %v192_v13  ;;  %v4666_v59 = vld [vmem:[#allocation8 + $0x5a4] sm:$0xf]  ;;  %v3993_v61 = vld [vmem:[#allocation8 + $0x5b0] sm:$0xf0]  ;;  %v3503_v22 = vld [vmem:[#allocation8 + $0x1c8] sm:$0xf] }
  0xe8   :  { %v645_v49 = vmax.f32 %v621_v25, 0.0  ;;  %v3660_v58 = vor.u32 %v4582_v42, %v3657_v41  ;;  %v4702_v4 = vld [vmem:[#allocation8 + $0x6c4] sm:$0xf]  ;;  %v4121_v17 = vld [vmem:[#allocation8 + $0x6b0] sm:$0xf0]  ;;  %v3980_v18 = vor.u32 %v4662_v11, %v3977_v12 }
  0xe9   :  { %v651_v14 = vmax.f32 %v595_v3, 0.0  ;;  %v652_v19 = vmax.f32 %v609_v9, 0.0  ;;  %2368 = vmatpush.bf16.msra.mxu3 %v3692_v15  ;;  %v646_v56 = vmax.f32 %v635_v33, 0.0  ;;  %v3868_v3 = vor.u32 %v4634_v53, %v3865_v55  ;;  %v4630_v9 = vld [vmem:[#allocation8 + $0x484] sm:$0xf] }
  0xea   :  { %2354 = vmatpush.bf16.msra.mxu2 %v3564_v10  ;;  %2328 = vmatpush.bf16.msra.mxu0 %v3276_v16  ;;  %v3849_v10 = vld [vmem:[#allocation8 + $0x490] sm:$0xf0]  ;;  %v4698_v16 = vld [vmem:[#allocation8 + $0x6a4] sm:$0xf] }
  0xeb   :  { %v5073_v23 = vpack.c.bf16 %v651_v14, %v643_v1  ;;  %v5075_v27 = vpack.c.bf16 %v652_v19, %v644_v7  ;;  %2342 = vmatpush.bf16.msra.mxu1 %v3404_v20  ;;  %v4284_v1 = vor.u32 %v4738_v47, %v4281_v48  ;;  %v3996_v7 = vor.u32 %v4666_v59, %v3993_v61  ;;  %v4730_v19 = vld [vmem:[#allocation8 + $0x7a4] sm:$0xf]  ;;  %v4249_v20 = vld [vmem:[#allocation8 + $0x7b0] sm:$0xf0] }
  0xec   :  { %v3852_v15 = vor.u32 %v4630_v9, %v3849_v10  ;;  %v3961_v25 = vld [vmem:[#allocation8 + $0x570] sm:$0xf0]  ;;  %v4622_v36 = vld [vmem:[#allocation8 + $0x444] sm:$0xf]  ;;  %v4549_v9 = vld [vmem:[#allocation8 + $0x1f4] sm:$0xf0] }
  0xed   :  { %v622_v34 = vpop.f32.mrf.mxu2  ;;  %v636_v40 = vpop.f32.mrf.mxu3  ;;  %2273 = vmatmul.bf16.vlgmr.msrb.gmra.mxu0 %v5073_v23  ;;  %2287 = vmatmul.bf16.vlgmr.msrb.gmra.mxu1 %v5075_v27  ;;  %v4690_v41 = vld [vmem:[#allocation8 + $0x664] sm:$0xf]  ;;  %v4217_v47 = vld [vmem:[#allocation8 + $0x770] sm:$0xf0] }
  0xee   :  { %v623_v39 = vadd.f32 %v622_v34, %v191_v8  ;;  %v637_v44 = vadd.f32 %v636_v40, %v192_v13  ;;  %2377 = vmatpush.bf16.msrb.mxu0 %v3900_v24  ;;  %2355 = vmatpush.bf16.msra.mxu2 %v3548_v28  ;;  %v4265_v8 = vld [vmem:[#allocation8 + $0x7d0] sm:$0xf0]  ;;  %v4140_v13 = vor.u32 %v4702_v4, %v4137_v5  ;;  %v4658_v24 = vld [vmem:[#allocation8 + $0x564] sm:$0xf]  ;;  %v3391_v5 = vld [vmem:[#allocation8 + $0xe8] sm:$0xf] }
  0xef   :  { %2391 = vmatpush.bf16.msrb.mxu1 %v4028_v2  ;;  %2369 = vmatpush.bf16.msra.mxu3 %v3676_v35  ;;  %v4268_v14 = vor.u32 %v4734_v6, %v4265_v8  ;;  %v4124_v2 = vor.u32 %v4698_v16, %v4121_v17  ;;  %v4252_v28 = vor.u32 %v4730_v19, %v4249_v20  ;;  %v4726_v34 = vld [vmem:[#allocation8 + $0x784] sm:$0xf]  ;;  %v4233_v35 = vld [vmem:[#allocation8 + $0x790] sm:$0xf0]  ;;  %v3519_v8 = vld [vmem:[#allocation8 + $0x1e8] sm:$0xf] }
  0xf0   :  { %v653_v50 = vmax.f32 %v623_v39, 0.0  ;;  %v654_v57 = vmax.f32 %v637_v44, 0.0  ;;  %v3964_v33 = vor.u32 %v4658_v24, %v3961_v25  ;;  %v3945_v39 = vld [vmem:[#allocation8 + $0x550] sm:$0xf0]  ;;  %v4108_v40 = vor.u32 %v4694_v29, %v4105_v30  ;;  %v4618_v48 = vld [vmem:[#allocation8 + $0x424] sm:$0xf] }
  0xf1   :  { %v4236_v42 = vor.u32 %v4726_v34, %v4233_v35  ;;  %v3820_v44 = vor.u32 %v4622_v36, %v3817_v37  ;;  %v4220_v53 = vor.u32 %v4722_v46, %v4217_v47  ;;  %v4686_v55 = vld [vmem:[#allocation8 + $0x644] sm:$0xf]  ;;  %v4201_v61 = vld [vmem:[#allocation8 + $0x750] sm:$0xf0]  ;;  %v3375_v19 = vld [vmem:[#allocation8 + $0xc8] sm:$0xf] }
  0xf2   :  { %v5079_v62 = vpack.c.bf16 %v653_v50, %v645_v49  ;;  %v5081_v0 = vpack.c.bf16 %v654_v57, %v646_v56  ;;  %2378 = vmatpush.bf16.msrb.mxu0 %v3884_v45  ;;  %2356 = vmatpush.bf16.msra.mxu2 %v3532_v52  ;;  %v3948_v45 = vor.u32 %v4654_v38, %v3945_v39  ;;  %v3801_v49 = vld [vmem:[#allocation8 + $0x430] sm:$0xf0]  ;;  %v4650_v50 = vld [vmem:[#allocation8 + $0x524] sm:$0xf]  ;;  %v4545_v24 = vld [vmem:[#allocation8 + $0x1d4] sm:$0xf0] }
  0xf3   :  { %2392 = vmatpush.bf16.msrb.mxu1 %v4012_v51  ;;  %2370 = vmatpush.bf16.msra.mxu3 %v3660_v58  ;;  %v3929_v51 = vld [vmem:[#allocation8 + $0x530] sm:$0xf0]  ;;  %v4092_v52 = vor.u32 %v4690_v41, %v4089_v43  ;;  %v4718_v57 = vld [vmem:[#allocation8 + $0x744] sm:$0xf]  ;;  %v3804_v58 = vor.u32 %v4618_v48, %v3801_v49  ;;  %v3376_v34 = vor.u32 %v4513_v21, %v3375_v19  ;;  %v3775_v36 = vld [vmem:[#allocation8 + $0x3e8] sm:$0xf] }
  0xf4   :  { %2301 = vmatmul.bf16.vlgmr.msrb.gmra.mxu2 %v5079_v62  ;;  %2315 = vmatmul.bf16.vlgmr.msrb.gmra.mxu3 %v5081_v0  ;;  %v4073_v56 = vld [vmem:[#allocation8 + $0x650] sm:$0xf0]  ;;  %v3932_v59 = vor.u32 %v4650_v50, %v3929_v51  ;;  %v4204_v10 = vor.u32 %v4718_v57, %v4201_v61  ;;  %v4682_v11 = vld [vmem:[#allocation8 + $0x624] sm:$0xf]  ;;  %v3504_v35 = vor.u32 %v4545_v24, %v3503_v22  ;;  %v4613_v37 = vld [vmem:[#allocation8 + $0x3f4] sm:$0xf0] }
  0xf5   :  { %v3913_v4 = vld [vmem:[#allocation8 + $0x510] sm:$0xf0]  ;;  %v4076_v6 = vor.u32 %v4686_v55, %v4073_v56  ;;  %v4710_v29 = vld [vmem:[#allocation8 + $0x704] sm:$0xf]  ;;  %v3359_v38 = vld [vmem:[#allocation8 + $0xa8] sm:$0xf] }
  0xf6   :  { %2405 = vmatpush.bf16.msrb.mxu2 %v4156_v63  ;;  %2379 = vmatpush.bf16.msrb.mxu0 %v3868_v3  ;;  %v4614_v63 = vld [vmem:[#allocation8 + $0x404] sm:$0xf]  ;;  %v4057_v12 = vld [vmem:[#allocation8 + $0x630] sm:$0xf0]  ;;  %v4541_v41 = vld [vmem:[#allocation8 + $0x1b4] sm:$0xf0] }
  0xf7   :  { %2419 = vmatpush.bf16.msrb.mxu3 %v4284_v1  ;;  %2393 = vmatpush.bf16.msrb.mxu1 %v3996_v7  ;;  %v3785_v1 = vld [vmem:[#allocation8 + $0x410] sm:$0xf0]  ;;  %v4646_v3 = vld [vmem:[#allocation8 + $0x504] sm:$0xf]  ;;  %v4517_v7 = vld [vmem:[#allocation8 + $0xf4] sm:$0xf0]  ;;  %v4060_v20 = vor.u32 %v4682_v11, %v4057_v12 }
  0xf8   :  { %v4185_v16 = vld [vmem:[#allocation8 + $0x730] sm:$0xf0]  ;;  %v3392_v17 = vor.u32 %v4517_v7, %v3391_v5  ;;  %v3631_v46 = vld [vmem:[#allocation8 + $0x2c8] sm:$0xf]  ;;  %v4577_v47 = vld [vmem:[#allocation8 + $0x2d4] sm:$0xf0] }
  0xf9   :  { %v4169_v30 = vld [vmem:[#allocation8 + $0x710] sm:$0xf0]  ;;  %v3759_v50 = vld [vmem:[#allocation8 + $0x3c8] sm:$0xf]  ;;  %v4609_v51 = vld [vmem:[#allocation8 + $0x3d4] sm:$0xf0]  ;;  %v3632_v57 = vor.u32 %v4577_v47, %v3631_v46 }
  0xfa   :  { %2406 = vmatpush.bf16.msrb.mxu2 %v4140_v13  ;;  %2380 = vmatpush.bf16.msrb.mxu0 %v3852_v15  ;;  %v3788_v13 = vor.u32 %v4614_v63, %v3785_v1  ;;  %v4714_v15 = vld [vmem:[#allocation8 + $0x724] sm:$0xf]  ;;  %v4172_v43 = vor.u32 %v4710_v29, %v4169_v30  ;;  %v3471_v55 = vld [vmem:[#allocation8 + $0x188] sm:$0xf]  ;;  %v4537_v56 = vld [vmem:[#allocation8 + $0x194] sm:$0xf0] }
  0xfb   :  { %2420 = vmatpush.bf16.msrb.mxu3 %v4268_v14  ;;  %2394 = vmatpush.bf16.msrb.mxu1 %v3980_v18  ;;  %v3916_v14 = vor.u32 %v4646_v3, %v3913_v4  ;;  %v3520_v18 = vor.u32 %v4549_v9, %v3519_v8  ;;  %v4188_v25 = vor.u32 %v4714_v15, %v4185_v16  ;;  %v4573_v61 = vld [vmem:[#allocation8 + $0x2b4] sm:$0xf0]  ;;  %v3743_v3 = vld [vmem:[#allocation8 + $0x3a8] sm:$0xf] }
  0xfc   :  { %v3472_v1 = vor.u32 %v4537_v56, %v3471_v55  ;;  %v4605_v4 = vld [vmem:[#allocation8 + $0x3b4] sm:$0xf0]  ;;  %v3327_v5 = vld [vmem:[#allocation8 + $0x68] sm:$0xf] }
  0xfd   :  { %2329 = vmatmul.bf16.vlgmr.msra.gmra.mxu0 %v5057_v26  ;;  %2343 = vmatmul.bf16.vlgmr.msra.gmra.mxu1 %v5059_v31  ;;  %v3455_v7 = vld [vmem:[#allocation8 + $0x168] sm:$0xf]  ;;  %v4533_v8 = vld [vmem:[#allocation8 + $0x174] sm:$0xf0] }
  0xfe   :  { %2407 = vmatpush.bf16.msrb.mxu2 %v4124_v2  ;;  %2381 = vmatpush.bf16.msrb.mxu0 %v3836_v32  ;;  %v4678_v2 = vld [vmem:[#allocation8 + $0x604] sm:$0xf]  ;;  %v3647_v32 = vld [vmem:[#allocation8 + $0x2e8] sm:$0xf]  ;;  %v4569_v12 = vld [vmem:[#allocation8 + $0x294] sm:$0xf0] }
  0xff   :  { %2421 = vmatpush.bf16.msrb.mxu3 %v4252_v28  ;;  %2395 = vmatpush.bf16.msrb.mxu1 %v3964_v33  ;;  %v4041_v28 = vld [vmem:[#allocation8 + $0x610] sm:$0xf0]  ;;  %v4581_v33 = vld [vmem:[#allocation8 + $0x2f4] sm:$0xf0]  ;;  %v3599_v11 = vld [vmem:[#allocation8 + $0x288] sm:$0xf] }
 0x100   :  { %v4044_v39 = vor.u32 %v4678_v2, %v4041_v28  ;;  %v3727_v15 = vld [vmem:[#allocation8 + $0x388] sm:$0xf]  ;;  %v4601_v16 = vld [vmem:[#allocation8 + $0x394] sm:$0xf0]  ;;  %v3600_v21 = vor.u32 %v4569_v12, %v3599_v11 }
 0x101   :  { %v3439_v19 = vld [vmem:[#allocation8 + $0x148] sm:$0xf]  ;;  %v3728_v22 = vor.u32 %v4601_v16, %v3727_v15  ;;  %v4597_v30 = vld [vmem:[#allocation8 + $0x374] sm:$0xf0] }
 0x102   :  { %2408 = vmatpush.bf16.msrb.mxu2 %v4108_v40  ;;  %2382 = vmatpush.bf16.msrb.mxu0 %v3820_v44  ;;  %v4509_v40 = vld [vmem:[#allocation8 + $0xb4] sm:$0xf0]  ;;  %v3648_v44 = vor.u32 %v4581_v33, %v3647_v32  ;;  %v3583_v24 = vld [vmem:[#allocation8 + $0x268] sm:$0xf] }
 0x103   :  { %2422 = vmatpush.bf16.msrb.mxu3 %v4236_v42  ;;  %2396 = vmatpush.bf16.msrb.mxu1 %v3948_v45  ;;  %v3487_v42 = vld [vmem:[#allocation8 + $0x1a8] sm:$0xf]  ;;  %v3776_v45 = vor.u32 %v4613_v37, %v3775_v36  ;;  %v3360_v48 = vor.u32 %v4509_v40, %v3359_v38  ;;  %v4493_v33 = vld [vmem:[#allocation8 + $0x34] sm:$0xf0] }
 0x104   :  { %2357 = vmatmul.bf16.vlgmr.msra.gmra.mxu2 %v5063_v54  ;;  %2371 = vmatmul.bf16.vlgmr.msra.gmra.mxu3 %v5065_v60  ;;  %v3488_v49 = vor.u32 %v4541_v41, %v3487_v42  ;;  %v3711_v29 = vld [vmem:[#allocation8 + $0x368] sm:$0xf]  ;;  %v4521_v47 = vld [vmem:[#allocation8 + $0x114] sm:$0xf0] }
 0x105   :  { %v3295_v32 = vld [vmem:[#allocation8 + $0x28] sm:$0xf]  ;;  %v3712_v37 = vor.u32 %v4597_v30, %v3711_v29  ;;  %v4557_v56 = vld [vmem:[#allocation8 + $0x234] sm:$0xf0] }
 0x106   :  { %2409 = vmatpush.bf16.msrb.mxu2 %v4092_v52  ;;  %2383 = vmatpush.bf16.msrb.mxu0 %v3804_v58  ;;  %v3343_v52 = vld [vmem:[#allocation8 + $0x88] sm:$0xf]  ;;  %v3760_v58 = vor.u32 %v4609_v51, %v3759_v50  ;;  %v3296_v42 = vor.u32 %v4493_v33, %v3295_v32  ;;  %v4645_v50 = vld [vmem:[#allocation8 + $0x4f4] sm:$0xf0] }
 0x107   :  { %2423 = vmatpush.bf16.msrb.mxu3 %v4220_v53  ;;  %2397 = vmatpush.bf16.msrb.mxu1 %v3932_v59  ;;  %v4505_v53 = vld [vmem:[#allocation8 + $0x94] sm:$0xf0]  ;;  %v3615_v59 = vld [vmem:[#allocation8 + $0x2a8] sm:$0xf] }
 0x108   :  { %v3344_v63 = vor.u32 %v4505_v53, %v3343_v52  ;;  %v3616_v9 = vor.u32 %v4573_v61, %v3615_v59  ;;  %v3567_v38 = vld [vmem:[#allocation8 + $0x248] sm:$0xf]  ;;  %v4677_v52 = vld [vmem:[#allocation8 + $0x5f4] sm:$0xf0] }
 0x109   :  { %v3695_v40 = vld [vmem:[#allocation8 + $0x348] sm:$0xf]  ;;  %v4589_v61 = vld [vmem:[#allocation8 + $0x334] sm:$0xf0] }
 0x10a   :  { %2410 = vmatpush.bf16.msrb.mxu2 %v4076_v6  ;;  %2384 = vmatpush.bf16.msrb.mxu0 %v3788_v13  ;;  %v4501_v6 = vld [vmem:[#allocation8 + $0x74] sm:$0xf0]  ;;  %v3407_v46 = vld [vmem:[#allocation8 + $0x108] sm:$0xf] }
 0x10b   :  { %2424 = vmatpush.bf16.msrb.mxu3 %v4204_v10  ;;  %2398 = vmatpush.bf16.msrb.mxu1 %v3916_v14  ;;  %v3744_v10 = vor.u32 %v4605_v4, %v3743_v3  ;;  %v3328_v13 = vor.u32 %v4501_v6, %v3327_v5  ;;  %v3456_v14 = vor.u32 %v4533_v8, %v3455_v7  ;;  %v4031_v51 = vld [vmem:[#allocation8 + $0x5e8] sm:$0xf]  ;;  %v4641_v5 = vld [vmem:[#allocation8 + $0x4d4] sm:$0xf0] }
 0x10c   :  { %v3551_v55 = vld [vmem:[#allocation8 + $0x228] sm:$0xf]  ;;  %v4673_v7 = vld [vmem:[#allocation8 + $0x5d4] sm:$0xf0] }
 0x10d   :  { %2385 = vmatmul.bf16.vlgmr.msrb.gmra.mxu0 %v5073_v23  ;;  %v3679_v59 = vld [vmem:[#allocation8 + $0x328] sm:$0xf]  ;;  %v3552_v4 = vor.u32 %v4557_v56, %v3551_v55  ;;  %v4585_v12 = vld [vmem:[#allocation8 + $0x314] sm:$0xf0] }
 0x10e   :  { %2433 = vmatpush.bf16.msra.mxu0 %v3392_v17  ;;  %2411 = vmatpush.bf16.msrb.mxu2 %v4060_v20  ;;  %v3311_v17 = vld [vmem:[#allocation8 + $0x48] sm:$0xf]  ;;  %v4529_v20 = vld [vmem:[#allocation8 + $0x154] sm:$0xf0]  ;;  %v3680_v8 = vor.u32 %v4589_v61, %v3679_v59 }
 0x10f   :  { %2447 = vmatpush.bf16.msra.mxu1 %v3520_v18  ;;  %2425 = vmatpush.bf16.msrb.mxu3 %v4188_v25  ;;  %v4497_v18 = vld [vmem:[#allocation8 + $0x54] sm:$0xf0]  ;;  %v3440_v28 = vor.u32 %v4529_v20, %v3439_v19  ;;  %v3887_v3 = vld [vmem:[#allocation8 + $0x4c8] sm:$0xf] }
 0x110   :  { %2399 = vmatmul.bf16.vlgmr.msrb.gmra.mxu1 %v5075_v27  ;;  %v4565_v25 = vld [vmem:[#allocation8 + $0x274] sm:$0xf0]  ;;  %v3312_v2 = vor.u32 %v4497_v18, %v3311_v17  ;;  %v4015_v6 = vld [vmem:[#allocation8 + $0x5c8] sm:$0xf]  ;;  %v3888_v15 = vor.u32 %v4641_v5, %v3887_v3 }
 0x111   :  { %v3584_v36 = vor.u32 %v4565_v25, %v3583_v24  ;;  %v3663_v11 = vld [vmem:[#allocation8 + $0x308] sm:$0xf]  ;;  %v4016_v16 = vor.u32 %v4673_v7, %v4015_v6  ;;  %v4741_v18 = vld [vmem:[#allocation8 + $0x7f4] sm:$0xf0] }
 0x112   :  { %2434 = vmatpush.bf16.msra.mxu0 %v3376_v34  ;;  %2412 = vmatpush.bf16.msrb.mxu2 %v4044_v39  ;;  %v3423_v34 = vld [vmem:[#allocation8 + $0x128] sm:$0xf]  ;;  %v4561_v39 = vld [vmem:[#allocation8 + $0x254] sm:$0xf0] }
 0x113   :  { %2448 = vmatpush.bf16.msra.mxu1 %v3504_v35  ;;  %2426 = vmatpush.bf16.msrb.mxu3 %v4172_v43  ;;  %v4525_v35 = vld [vmem:[#allocation8 + $0x134] sm:$0xf0]  ;;  %v4287_v17 = vld [vmem:[#allocation8 + $0x7e8] sm:$0xf] }
 0x114   :  { %v3424_v41 = vor.u32 %v4525_v35, %v3423_v34  ;;  %v4593_v43 = vld [vmem:[#allocation8 + $0x354] sm:$0xf0]  ;;  %v3871_v20 = vld [vmem:[#allocation8 + $0x4a8] sm:$0xf] }
 0x115   :  { %2413 = vmatmul.bf16.vlgmr.msrb.gmra.mxu2 %v5079_v62  ;;  %v3696_v53 = vor.u32 %v4593_v43, %v3695_v40  ;;  %v3999_v25 = vld [vmem:[#allocation8 + $0x5a8] sm:$0xf]  ;;  %v4705_v30 = vld [vmem:[#allocation8 + $0x6d4] sm:$0xf0] }
 0x116   :  { %2461 = vmatpush.bf16.msra.mxu2 %v3648_v44  ;;  %2435 = vmatpush.bf16.msra.mxu0 %v3360_v48  ;;  %v3279_v44 = vld [vmem:[#allocation8 + $0x8] sm:$0xf]  ;;  %v4737_v34 = vld [vmem:[#allocation8 + $0x7d4] sm:$0xf0] }
 0x117   :  { %2475 = vmatpush.bf16.msra.mxu3 %v3776_v45  ;;  %2449 = vmatpush.bf16.msra.mxu1 %v3488_v49  ;;  %v4489_v45 = vld [vmem:[#allocation8 + $0x14] sm:$0xf0]  ;;  %v3903_v48 = vld [vmem:[#allocation8 + $0x4e8] sm:$0xf]  ;;  %v3568_v49 = vor.u32 %v4561_v39, %v3567_v38 }
 0x118   :  { %2427 = vmatmul.bf16.vlgmr.msrb.gmra.mxu3 %v5081_v0  ;;  %v4143_v29 = vld [vmem:[#allocation8 + $0x6c8] sm:$0xf]  ;;  %v4665_v40 = vld [vmem:[#allocation8 + $0x594] sm:$0xf0] }
 0x119   :  { %v4271_v33 = vld [vmem:[#allocation8 + $0x7c8] sm:$0xf]  ;;  %v4144_v38 = vor.u32 %v4705_v30, %v4143_v29  ;;  %v4701_v43 = vld [vmem:[#allocation8 + $0x6b4] sm:$0xf0] }
 0x11a   :  { %2462 = vmatpush.bf16.msra.mxu2 %v3632_v57  ;;  %2436 = vmatpush.bf16.msra.mxu0 %v3344_v63  ;;  %v3280_v57 = vor.u32 %v4489_v45, %v3279_v44  ;;  %v3904_v63 = vor.u32 %v4645_v50, %v3903_v48  ;;  %v3983_v39 = vld [vmem:[#allocation8 + $0x588] sm:$0xf]  ;;  %v4697_v56 = vld [vmem:[#allocation8 + $0x694] sm:$0xf0] }
 0x11b   :  { %2476 = vmatpush.bf16.msra.mxu3 %v3760_v58  ;;  %2450 = vmatpush.bf16.msra.mxu1 %v3472_v1  ;;  %v3408_v58 = vor.u32 %v4521_v47, %v3407_v46  ;;  %v4032_v1 = vor.u32 %v4677_v52, %v4031_v51  ;;  %v4255_v45 = vld [vmem:[#allocation8 + $0x7a8] sm:$0xf]  ;;  %v4733_v46 = vld [vmem:[#allocation8 + $0x7b4] sm:$0xf0]  ;;  %v3984_v47 = vor.u32 %v4665_v40, %v3983_v39 }
 0x11c   :  { %v3839_v48 = vld [vmem:[#allocation8 + $0x468] sm:$0xf]  ;;  %v4661_v52 = vld [vmem:[#allocation8 + $0x574] sm:$0xf0] }
 0x11d   :  { %v3967_v51 = vld [vmem:[#allocation8 + $0x568] sm:$0xf]  ;;  %v4729_v59 = vld [vmem:[#allocation8 + $0x794] sm:$0xf0] }
 0x11e   :  { %2463 = vmatpush.bf16.msra.mxu2 %v3616_v9  ;;  %2437 = vmatpush.bf16.msra.mxu0 %v3328_v13  ;;  %v3535_v9 = vld [vmem:[#allocation8 + $0x208] sm:$0xf]  ;;  %v3968_v61 = vor.u32 %v4661_v52, %v3967_v51  ;;  %v4657_v5 = vld [vmem:[#allocation8 + $0x554] sm:$0xf0] }
 0x11f   :  { %2477 = vmatpush.bf16.msra.mxu3 %v3744_v10  ;;  %2451 = vmatpush.bf16.msra.mxu1 %v3456_v14  ;;  %v4553_v10 = vld [vmem:[#allocation8 + $0x214] sm:$0xf0]  ;;  %v4159_v13 = vld [vmem:[#allocation8 + $0x6e8] sm:$0xf] }
 0x120   :  { %v4709_v14 = vld [vmem:[#allocation8 + $0x6f4] sm:$0xf0]  ;;  %v3536_v19 = vor.u32 %v4553_v10, %v3535_v9  ;;  %v4111_v55 = vld [vmem:[#allocation8 + $0x688] sm:$0xf] }
 0x121   :  { %v4160_v24 = vor.u32 %v4709_v14, %v4159_v13  ;;  %v4112_v3 = vor.u32 %v4697_v56, %v4111_v55  ;;  %v4095_v7 = vld [vmem:[#allocation8 + $0x668] sm:$0xf]  ;;  %v4621_v14 = vld [vmem:[#allocation8 + $0x434] sm:$0xf0] }
 0x122   :  { %2464 = vmatpush.bf16.msra.mxu2 %v3600_v21  ;;  %2438 = vmatpush.bf16.msra.mxu0 %v3312_v2  ;;  %v4637_v21 = vld [vmem:[#allocation8 + $0x4b4] sm:$0xf0]  ;;  %v4223_v10 = vld [vmem:[#allocation8 + $0x768] sm:$0xf] }
 0x123   :  { %2478 = vmatpush.bf16.msra.mxu3 %v3728_v22  ;;  %2452 = vmatpush.bf16.msra.mxu1 %v3440_v28  ;;  %v3664_v22 = vor.u32 %v4585_v12, %v3663_v11  ;;  %v4669_v2 = vld [vmem:[#allocation8 + $0x5b4] sm:$0xf0]  ;;  %v4288_v28 = vor.u32 %v4741_v18, %v4287_v17  ;;  %v3872_v32 = vor.u32 %v4637_v21, %v3871_v20  ;;  %v3807_v13 = vld [vmem:[#allocation8 + $0x428] sm:$0xf] }
 0x124   :  { %v4000_v35 = vor.u32 %v4669_v2, %v3999_v25  ;;  %v4725_v11 = vld [vmem:[#allocation8 + $0x774] sm:$0xf0]  ;;  %v3808_v21 = vor.u32 %v4621_v14, %v3807_v13  ;;  %v3791_v25 = vld [vmem:[#allocation8 + $0x408] sm:$0xf]  ;;  %v4607_v14 = vld [vmem:[#allocation8 + $0x3cc] sm:$0xf] }
 0x125   :  { %v4653_v17 = vld [vmem:[#allocation8 + $0x534] sm:$0xf0]  ;;  %v4224_v18 = vor.u32 %v4725_v11, %v4223_v10  ;;  %v3919_v29 = vld [vmem:[#allocation8 + $0x508] sm:$0xf]  ;;  %v4575_v11 = vld [vmem:[#allocation8 + $0x2cc] sm:$0xf] }
 0x126   :  { %2465 = vmatpush.bf16.msra.mxu2 %v3584_v36  ;;  %2439 = vmatpush.bf16.msra.mxu0 %v3296_v42  ;;  %v3855_v36 = vld [vmem:[#allocation8 + $0x488] sm:$0xf]  ;;  %v4272_v42 = vor.u32 %v4737_v34, %v4271_v33  ;;  %v4689_v20 = vld [vmem:[#allocation8 + $0x654] sm:$0xf0]  ;;  %v4515_v33 = vld [vmem:[#allocation8 + $0xec] sm:$0xf] }
 0x127   :  { %2479 = vmatpush.bf16.msra.mxu3 %v3712_v37  ;;  %2453 = vmatpush.bf16.msra.mxu1 %v3424_v41  ;;  %v4633_v37 = vld [vmem:[#allocation8 + $0x494] sm:$0xf0]  ;;  %v4127_v41 = vld [vmem:[#allocation8 + $0x6a8] sm:$0xf]  ;;  %v3393_v34 = vld [vmem:[#allocation8 + $0xf8] sm:$0xf0] }
 0x128   :  { %v3856_v44 = vor.u32 %v4633_v37, %v3855_v36  ;;  %v4128_v50 = vor.u32 %v4701_v43, %v4127_v41  ;;  %v4649_v30 = vld [vmem:[#allocation8 + $0x514] sm:$0xf0]  ;;  %v3521_v37 = vld [vmem:[#allocation8 + $0x1f8] sm:$0xf0]  ;;  %v4047_v52 = vld [vmem:[#allocation8 + $0x608] sm:$0xf] }
 0x129   :  { %v4685_v39 = vld [vmem:[#allocation8 + $0x634] sm:$0xf0]  ;;  %v3920_v43 = vor.u32 %v4649_v30, %v3919_v29  ;;  %v4175_v55 = vld [vmem:[#allocation8 + $0x708] sm:$0xf]  ;;  %v3745_v29 = vld [vmem:[#allocation8 + $0x3b8] sm:$0xf0] }
 0x12a   :  { %2466 = vmatpush.bf16.msra.mxu2 %v3568_v49  ;;  %2440 = vmatpush.bf16.msra.mxu0 %v3280_v57  ;;  %v4629_v49 = vld [vmem:[#allocation8 + $0x474] sm:$0xf0] }
 0x12b   :  { %2480 = vmatpush.bf16.msra.mxu3 %v3696_v53  ;;  %2454 = vmatpush.bf16.msra.mxu1 %v3408_v58  ;;  %v4256_v53 = vor.u32 %v4733_v46, %v4255_v45  ;;  %v3840_v57 = vor.u32 %v4629_v49, %v3839_v48  ;;  %v4239_v58 = vld [vmem:[#allocation8 + $0x788] sm:$0xf]  ;;  %v4717_v41 = vld [vmem:[#allocation8 + $0x734] sm:$0xf0]  ;;  %v4511_v45 = vld [vmem:[#allocation8 + $0xcc] sm:$0xf] }
 0x12c   :  { %v4240_v6 = vor.u32 %v4729_v59, %v4239_v58  ;;  %v3377_v48 = vld [vmem:[#allocation8 + $0xd8] sm:$0xf0]  ;;  %v4543_v49 = vld [vmem:[#allocation8 + $0x1cc] sm:$0xf]  ;;  %v4713_v56 = vld [vmem:[#allocation8 + $0x714] sm:$0xf0] }
 0x12d   :  { %2441 = vmatmul.bf16.vlgmr.msra.gmra.mxu0 %v5057_v26  ;;  %v3649_v58 = vld [vmem:[#allocation8 + $0x2f8] sm:$0xf0]  ;;  %v3380_v59 = vor.u32 %v4511_v45, %v3377_v48 }
 0x12e   :  { %2489 = vmatpush.bf16.msrb.mxu0 %v3904_v63  ;;  %2467 = vmatpush.bf16.msra.mxu2 %v3552_v4  ;;  %v3823_v63 = vld [vmem:[#allocation8 + $0x448] sm:$0xf]  ;;  %v3313_v45 = vld [vmem:[#allocation8 + $0x58] sm:$0xf0] }
 0x12f   :  { %2503 = vmatpush.bf16.msrb.mxu1 %v4032_v1  ;;  %2481 = vmatpush.bf16.msra.mxu3 %v3680_v8  ;;  %v4625_v1 = vld [vmem:[#allocation8 + $0x454] sm:$0xf0]  ;;  %v3951_v4 = vld [vmem:[#allocation8 + $0x548] sm:$0xf]  ;;  %v3441_v48 = vld [vmem:[#allocation8 + $0x158] sm:$0xf0] }
 0x130   :  { %2455 = vmatmul.bf16.vlgmr.msra.gmra.mxu1 %v5059_v31  ;;  %v4693_v8 = vld [vmem:[#allocation8 + $0x674] sm:$0xf0]  ;;  %v3824_v9 = vor.u32 %v4625_v1, %v3823_v63  ;;  %v3952_v12 = vor.u32 %v4657_v5, %v3951_v4  ;;  %v3777_v63 = vld [vmem:[#allocation8 + $0x3f8] sm:$0xf0]  ;;  %v4507_v4 = vld [vmem:[#allocation8 + $0xac] sm:$0xf] }
 0x131   :  { %v3361_v5 = vld [vmem:[#allocation8 + $0xb8] sm:$0xf0] }
 0x132   :  { %2490 = vmatpush.bf16.msrb.mxu0 %v3888_v15  ;;  %2468 = vmatpush.bf16.msra.mxu2 %v3536_v19  ;;  %v4096_v15 = vor.u32 %v4693_v8, %v4095_v7  ;;  %v4079_v19 = vld [vmem:[#allocation8 + $0x648] sm:$0xf]  ;;  %v4539_v8 = vld [vmem:[#allocation8 + $0x1ac] sm:$0xf]  ;;  %v3364_v13 = vor.u32 %v4507_v4, %v3361_v5  ;;  %v3569_v5 = vld [vmem:[#allocation8 + $0x258] sm:$0xf0] }
 0x133   :  { %2504 = vmatpush.bf16.msrb.mxu1 %v4016_v16  ;;  %2482 = vmatpush.bf16.msra.mxu3 %v3664_v22  ;;  %v3935_v16 = vld [vmem:[#allocation8 + $0x528] sm:$0xf]  ;;  %v4559_v4 = vld [vmem:[#allocation8 + $0x24c] sm:$0xf] }
 0x134   :  { %v4207_v22 = vld [vmem:[#allocation8 + $0x748] sm:$0xf]  ;;  %v3936_v2 = vor.u32 %v4653_v17, %v3935_v16  ;;  %v4503_v17 = vld [vmem:[#allocation8 + $0x8c] sm:$0xf] }
 0x135   :  { %2469 = vmatmul.bf16.vlgmr.msra.gmra.mxu2 %v5063_v54 }
 0x136   :  { %2517 = vmatpush.bf16.msrb.mxu2 %v4160_v24  ;;  %2491 = vmatpush.bf16.msrb.mxu0 %v3872_v32  ;;  %v4721_v24 = vld [vmem:[#allocation8 + $0x754] sm:$0xf0]  ;;  %v4080_v32 = vor.u32 %v4689_v20, %v4079_v19  ;;  %v4535_v20 = vld [vmem:[#allocation8 + $0x18c] sm:$0xf] }
 0x137   :  { %2531 = vmatpush.bf16.msrb.mxu3 %v4288_v28  ;;  %2505 = vmatpush.bf16.msrb.mxu1 %v4000_v35  ;;  %v4617_v28 = vld [vmem:[#allocation8 + $0x414] sm:$0xf0]  ;;  %v4547_v35 = vld [vmem:[#allocation8 + $0x1ec] sm:$0xf]  ;;  %v4208_v36 = vor.u32 %v4721_v24, %v4207_v22 }
 0x138   :  { %2483 = vmatmul.bf16.vlgmr.msra.gmra.mxu3 %v5065_v60  ;;  %v3792_v40 = vor.u32 %v4617_v28, %v3791_v25  ;;  %v3524_v46 = vor.u32 %v4547_v35, %v3521_v37  ;;  %v4571_v24 = vld [vmem:[#allocation8 + $0x2ac] sm:$0xf]  ;;  %v3617_v25 = vld [vmem:[#allocation8 + $0x2b8] sm:$0xf0] }
 0x139   :  { %v4603_v28 = vld [vmem:[#allocation8 + $0x3ac] sm:$0xf] }
 0x13a   :  { %2518 = vmatpush.bf16.msrb.mxu2 %v4144_v38  ;;  %2492 = vmatpush.bf16.msrb.mxu0 %v3856_v44  ;;  %v4063_v38 = vld [vmem:[#allocation8 + $0x628] sm:$0xf]  ;;  %v3396_v44 = vor.u32 %v4515_v33, %v3393_v34  ;;  %v3329_v33 = vld [vmem:[#allocation8 + $0x78] sm:$0xf0]  ;;  %v3620_v34 = vor.u32 %v4571_v24, %v3617_v25  ;;  %v4531_v35 = vld [vmem:[#allocation8 + $0x16c] sm:$0xf]  ;;  %v3748_v37 = vor.u32 %v4603_v28, %v3745_v29 }
 0x13b   :  { %2532 = vmatpush.bf16.msrb.mxu3 %v4272_v42  ;;  %2506 = vmatpush.bf16.msrb.mxu1 %v3984_v47  ;;  %v4191_v42 = vld [vmem:[#allocation8 + $0x728] sm:$0xf]  ;;  %v4064_v47 = vor.u32 %v4685_v39, %v4063_v38  ;;  %v4567_v38 = vld [vmem:[#allocation8 + $0x28c] sm:$0xf]  ;;  %v3601_v39 = vld [vmem:[#allocation8 + $0x298] sm:$0xf0] }
 0x13c   :  { %v4192_v51 = vor.u32 %v4717_v41, %v4191_v42  ;;  %v4599_v42 = vld [vmem:[#allocation8 + $0x38c] sm:$0xf]  ;;  %v3729_v41 = vld [vmem:[#allocation8 + $0x398] sm:$0xf0] }
 0x13d   :  { %v4587_v25 = vld [vmem:[#allocation8 + $0x32c] sm:$0xf] }
 0x13e   :  { %2519 = vmatpush.bf16.msrb.mxu2 %v4128_v50  ;;  %2493 = vmatpush.bf16.msrb.mxu0 %v3840_v57  ;;  %v3505_v50 = vld [vmem:[#allocation8 + $0x1d8] sm:$0xf0]  ;;  %v4579_v57 = vld [vmem:[#allocation8 + $0x2ec] sm:$0xf] }
 0x13f   :  { %2533 = vmatpush.bf16.msrb.mxu3 %v4256_v53  ;;  %2507 = vmatpush.bf16.msrb.mxu1 %v3968_v61  ;;  %v4681_v53 = vld [vmem:[#allocation8 + $0x614] sm:$0xf0]  ;;  %v4611_v61 = vld [vmem:[#allocation8 + $0x3ec] sm:$0xf]  ;;  %v3508_v1 = vor.u32 %v4543_v49, %v3505_v50  ;;  %v3652_v7 = vor.u32 %v4579_v57, %v3649_v58  ;;  %v3732_v49 = vor.u32 %v4599_v42, %v3729_v41  ;;  %v3297_v58 = vld [vmem:[#allocation8 + $0x38] sm:$0xf0] }
 0x140   :  { %v3780_v10 = vor.u32 %v4611_v61, %v3777_v63  ;;  %v4563_v50 = vld [vmem:[#allocation8 + $0x26c] sm:$0xf]  ;;  %v3665_v41 = vld [vmem:[#allocation8 + $0x318] sm:$0xf0] }
 0x141   :  { %v4491_v57 = vld [vmem:[#allocation8 + $0x2c] sm:$0xf] }
 0x142   :  { %2520 = vmatpush.bf16.msrb.mxu2 %v4112_v3  ;;  %2494 = vmatpush.bf16.msrb.mxu0 %v3824_v9  ;;  %v4048_v3 = vor.u32 %v4681_v53, %v4047_v52  ;;  %v3489_v9 = vld [vmem:[#allocation8 + $0x1b8] sm:$0xf0]  ;;  %v4595_v53 = vld [vmem:[#allocation8 + $0x36c] sm:$0xf] }
 0x143   :  { %2534 = vmatpush.bf16.msrb.mxu3 %v4240_v6  ;;  %2508 = vmatpush.bf16.msrb.mxu1 %v3952_v12  ;;  %v4176_v6 = vor.u32 %v4713_v56, %v4175_v55  ;;  %v3633_v12 = vld [vmem:[#allocation8 + $0x2d8] sm:$0xf0]  ;;  %v3492_v16 = vor.u32 %v4539_v8, %v3489_v9  ;;  %v4523_v63 = vld [vmem:[#allocation8 + $0x12c] sm:$0xf] }
 0x144   :  { %v3636_v19 = vor.u32 %v4575_v11, %v3633_v12  ;;  %v3713_v55 = vld [vmem:[#allocation8 + $0x378] sm:$0xf0]  ;;  %v4591_v8 = vld [vmem:[#allocation8 + $0x34c] sm:$0xf] }
 0x145   :  { %v3697_v9 = vld [vmem:[#allocation8 + $0x358] sm:$0xf0] }
 0x146   :  { %2521 = vmatpush.bf16.msrb.mxu2 %v4096_v15  ;;  %2495 = vmatpush.bf16.msrb.mxu0 %v3808_v21  ;;  %v3761_v15 = vld [vmem:[#allocation8 + $0x3d8] sm:$0xf0] }
 0x147   :  { %2535 = vmatpush.bf16.msrb.mxu3 %v4224_v18  ;;  %2509 = vmatpush.bf16.msrb.mxu1 %v3936_v2  ;;  %v3345_v18 = vld [vmem:[#allocation8 + $0x98] sm:$0xf0]  ;;  %v3764_v22 = vor.u32 %v4607_v14, %v3761_v15  ;;  %v3572_v15 = vor.u32 %v4559_v4, %v3569_v5  ;;  %v4735_v5 = vld [vmem:[#allocation8 + $0x7cc] sm:$0xf] }
 0x148   :  { %v3473_v21 = vld [vmem:[#allocation8 + $0x198] sm:$0xf0]  ;;  %v3348_v2 = vor.u32 %v4503_v17, %v3345_v18  ;;  %v4675_v18 = vld [vmem:[#allocation8 + $0x5ec] sm:$0xf] }
 0x149   :  { %v3476_v30 = vor.u32 %v4535_v20, %v3473_v21  ;;  %v3281_v12 = vld [vmem:[#allocation8 + $0x18] sm:$0xf0]  ;;  %v4555_v21 = vld [vmem:[#allocation8 + $0x22c] sm:$0xf] }
 0x14a   :  { %2522 = vmatpush.bf16.msrb.mxu2 %v4080_v32  ;;  %2496 = vmatpush.bf16.msrb.mxu0 %v3792_v40  ;;  %v4499_v32 = vld [vmem:[#allocation8 + $0x6c] sm:$0xf]  ;;  %v3409_v14 = vld [vmem:[#allocation8 + $0x118] sm:$0xf0] }
 0x14b   :  { %2536 = vmatpush.bf16.msrb.mxu3 %v4208_v36  ;;  %2510 = vmatpush.bf16.msrb.mxu1 %v3920_v43  ;;  %v3457_v36 = vld [vmem:[#allocation8 + $0x178] sm:$0xf0]  ;;  %v3332_v40 = vor.u32 %v4499_v32, %v3329_v33 }
 0x14c   :  { %v3460_v43 = vor.u32 %v4531_v35, %v3457_v36  ;;  %v3905_v17 = vld [vmem:[#allocation8 + $0x4f8] sm:$0xf0]  ;;  %v4671_v35 = vld [vmem:[#allocation8 + $0x5cc] sm:$0xf] }
 0x14d   :  { %2497 = vmatmul.bf16.vlgmr.msrb.gmra.mxu0 %v5073_v23  ;;  %v4033_v20 = vld [vmem:[#allocation8 + $0x5f8] sm:$0xf0] }
 0x14e   :  { %2545 = vmatpush.bf16.msra.mxu0 %v3396_v44  ;;  %2523 = vmatpush.bf16.msrb.mxu2 %v4064_v47  ;;  %v4495_v44 = vld [vmem:[#allocation8 + $0x4c] sm:$0xf]  ;;  %v4036_v32 = vor.u32 %v4675_v18, %v4033_v20  ;;  %v4017_v36 = vld [vmem:[#allocation8 + $0x5d8] sm:$0xf0] }
 0x14f   :  { %2559 = vmatpush.bf16.msra.mxu1 %v3524_v46  ;;  %2537 = vmatpush.bf16.msrb.mxu3 %v4192_v51  ;;  %v3604_v46 = vor.u32 %v4567_v38, %v3601_v39  ;;  %v4527_v47 = vld [vmem:[#allocation8 + $0x14c] sm:$0xf]  ;;  %v3585_v51 = vld [vmem:[#allocation8 + $0x278] sm:$0xf0]  ;;  %v3316_v52 = vor.u32 %v4495_v44, %v3313_v45 }
 0x150   :  { %2511 = vmatmul.bf16.vlgmr.msrb.gmra.mxu1 %v5075_v27  ;;  %v3444_v56 = vor.u32 %v4527_v47, %v3441_v48  ;;  %v3588_v61 = vor.u32 %v4563_v50, %v3585_v51  ;;  %v4551_v38 = vld [vmem:[#allocation8 + $0x20c] sm:$0xf]  ;;  %v3537_v39 = vld [vmem:[#allocation8 + $0x218] sm:$0xf0] }
 0x151   :  { %v4161_v44 = vld [vmem:[#allocation8 + $0x6f8] sm:$0xf0]  ;;  %v3540_v50 = vor.u32 %v4551_v38, %v3537_v39  ;;  %v4635_v51 = vld [vmem:[#allocation8 + $0x4ac] sm:$0xf] }
 0x152   :  { %2546 = vmatpush.bf16.msra.mxu0 %v3380_v59  ;;  %2524 = vmatpush.bf16.msrb.mxu2 %v4048_v3  ;;  %v5101_v59 = vpop.f32.mrf.mxu0  ;;  %v3716_v3 = vor.u32 %v4595_v53, %v3713_v55  ;;  %v4289_v47 = vld [vmem:[#allocation8 + $0x7f8] sm:$0xf0]  ;;  %v4655_v39 = vld [vmem:[#allocation8 + $0x54c] sm:$0xf] }
 0x153   :  { %2560 = vmatpush.bf16.msra.mxu1 %v3508_v1  ;;  %2538 = vmatpush.bf16.msrb.mxu3 %v4176_v6  ;;  %v3425_v1 = vld [vmem:[#allocation8 + $0x138] sm:$0xf0]  ;;  %v5103_v6 = vpop.f32.mrf.mxu1 }
 0x154   :  { %v3428_v11 = vor.u32 %v4523_v63, %v3425_v1  ;;  %v4703_v1 = vld [vmem:[#allocation8 + $0x6cc] sm:$0xf]  ;;  %v4257_v18 = vld [vmem:[#allocation8 + $0x7b8] sm:$0xf0] }
 0x155   :  { %2525 = vmatmul.bf16.vlgmr.msrb.gmra.mxu2 %v5079_v62 }
 0x156   :  { %2573 = vmatpush.bf16.msra.mxu2 %v3652_v7  ;;  %2547 = vmatpush.bf16.msra.mxu0 %v3364_v13  ;;  %v3300_v7 = vor.u32 %v4491_v57, %v3297_v58  ;;  %v4519_v13 = vld [vmem:[#allocation8 + $0x10c] sm:$0xf]  ;;  %v4001_v58 = vld [vmem:[#allocation8 + $0x5b8] sm:$0xf0] }
 0x157   :  { %2587 = vmatpush.bf16.msra.mxu3 %v3780_v10  ;;  %2561 = vmatpush.bf16.msra.mxu1 %v3492_v16  ;;  %v4487_v10 = vld [vmem:[#allocation8 + $0xc] sm:$0xf]  ;;  %v3412_v28 = vor.u32 %v4519_v13, %v3409_v14 }
 0x158   :  { %2539 = vmatmul.bf16.vlgmr.msrb.gmra.mxu3 %v5081_v0  ;;  %v4643_v16 = vld [vmem:[#allocation8 + $0x4ec] sm:$0xf]  ;;  %v3284_v24 = vor.u32 %v4487_v10, %v3281_v12  ;;  %v5109_v53 = vpop.f32.mrf.mxu2  ;;  %v3985_v12 = vld [vmem:[#allocation8 + $0x598] sm:$0xf0] }
 0x159   :  { %v3908_v29 = vor.u32 %v4643_v16, %v3905_v17  ;;  %v4667_v57 = vld [vmem:[#allocation8 + $0x5ac] sm:$0xf] }
 0x15a   :  { %2574 = vmatpush.bf16.msra.mxu2 %v3636_v19  ;;  %2548 = vmatpush.bf16.msra.mxu0 %v3348_v2  ;;  %v3700_v19 = vor.u32 %v4591_v8, %v3697_v9  ;;  %v3681_v2 = vld [vmem:[#allocation8 + $0x338] sm:$0xf0]  ;;  %v5105_v42 = vpop.f32.mrf.mxu0  ;;  %v4004_v8 = vor.u32 %v4667_v57, %v4001_v58  ;;  %v4631_v9 = vld [vmem:[#allocation8 + $0x48c] sm:$0xf] }
 0x15b   :  { %2588 = vmatpush.bf16.msra.mxu3 %v3764_v22  ;;  %2562 = vmatpush.bf16.msra.mxu1 %v3476_v30  ;;  %v3553_v22 = vld [vmem:[#allocation8 + $0x238] sm:$0xf0]  ;;  %v4639_v30 = vld [vmem:[#allocation8 + $0x4cc] sm:$0xf]  ;;  %v5107_v48 = vpop.f32.mrf.mxu1 }
 0x15c   :  { %v3556_v33 = vor.u32 %v4555_v21, %v3553_v22  ;;  %v4699_v14 = vld [vmem:[#allocation8 + $0x6ac] sm:$0xf]  ;;  %v3841_v22 = vld [vmem:[#allocation8 + $0x478] sm:$0xf0] }
 0x15d   :  { %v4731_v17 = vld [vmem:[#allocation8 + $0x7ac] sm:$0xf]  ;;  %v3937_v57 = vld [vmem:[#allocation8 + $0x538] sm:$0xf0] }
 0x15e   :  { %2575 = vmatpush.bf16.msra.mxu2 %v3620_v34  ;;  %2549 = vmatpush.bf16.msra.mxu0 %v3332_v40  ;;  %v3889_v34 = vld [vmem:[#allocation8 + $0x4d8] sm:$0xf0]  ;;  %v4583_v40 = vld [vmem:[#allocation8 + $0x30c] sm:$0xf] }
 0x15f   :  { %2589 = vmatpush.bf16.msra.mxu3 %v3748_v37  ;;  %2563 = vmatpush.bf16.msra.mxu1 %v3460_v43  ;;  %v3684_v37 = vor.u32 %v4587_v25, %v3681_v2  ;;  %v4707_v43 = vld [vmem:[#allocation8 + $0x6ec] sm:$0xf]  ;;  %v3892_v45 = vor.u32 %v4639_v30, %v3889_v34  ;;  %v3668_v55 = vor.u32 %v4583_v40, %v3665_v41  ;;  %v3969_v2 = vld [vmem:[#allocation8 + $0x578] sm:$0xf0] }
 0x160   :  { %v4627_v21 = vld [vmem:[#allocation8 + $0x46c] sm:$0xf]  ;;  %v5121_v30 = vpop.f32.mrf.mxu2  ;;  %v3953_v40 = vld [vmem:[#allocation8 + $0x558] sm:$0xf0] }
 0x161   :  { %v4659_v25 = vld [vmem:[#allocation8 + $0x56c] sm:$0xf] }
 0x162   :  { %2576 = vmatpush.bf16.msra.mxu2 %v3604_v46  ;;  %2550 = vmatpush.bf16.msra.mxu0 %v3316_v52  ;;  %v4739_v46 = vld [vmem:[#allocation8 + $0x7ec] sm:$0xf]  ;;  %v3873_v52 = vld [vmem:[#allocation8 + $0x4b8] sm:$0xf0] }
 0x163   :  { %2590 = vmatpush.bf16.msra.mxu3 %v3732_v49  ;;  %2564 = vmatpush.bf16.msra.mxu1 %v3444_v56  ;;  %v4020_v49 = vor.u32 %v4671_v35, %v4017_v36  ;;  %v4164_v56 = vor.u32 %v4707_v43, %v4161_v44  ;;  %v4292_v63 = vor.u32 %v4739_v46, %v4289_v47  ;;  %v4623_v36 = vld [vmem:[#allocation8 + $0x44c] sm:$0xf] }
 0x164   :  { %v3876_v4 = vor.u32 %v4635_v51, %v3873_v52  ;;  %v3972_v35 = vor.u32 %v4659_v25, %v3969_v2  ;;  %v4691_v44 = vld [vmem:[#allocation8 + $0x66c] sm:$0xf]  ;;  %v3809_v52 = vld [vmem:[#allocation8 + $0x438] sm:$0xf0] }
 0x165   :  { %v4723_v47 = vld [vmem:[#allocation8 + $0x76c] sm:$0xf]  ;;  %v4749_v2 = vld [vmem:[#allocation11 + $0x38] sm:$0xff] }
 0x166   :  { %2577 = vmatpush.bf16.msra.mxu2 %v3588_v61  ;;  %2551 = vmatpush.bf16.msra.mxu0 %v3300_v7  ;;  %v5112_v61 = vpop.f32.mrf.mxu3  ;;  %v4273_v7 = vld [vmem:[#allocation8 + $0x7d8] sm:$0xf0]  ;;  %v4619_v51 = vld [vmem:[#allocation8 + $0x42c] sm:$0xf] }
 0x167   :  { %2591 = vmatpush.bf16.msra.mxu3 %v3716_v3  ;;  %2565 = vmatpush.bf16.msra.mxu1 %v3428_v11  ;;  %v4145_v3 = vld [vmem:[#allocation8 + $0x6d8] sm:$0xf0]  ;;  %v4663_v11 = vld [vmem:[#allocation8 + $0x58c] sm:$0xf] }
 0x168   :  { %v4148_v10 = vor.u32 %v4703_v1, %v4145_v3  ;;  %v3988_v20 = vor.u32 %v4663_v11, %v3985_v12  ;;  %v4687_v1 = vld [vmem:[#allocation8 + $0x64c] sm:$0xf]  ;;  %v4081_v3 = vld [vmem:[#allocation8 + $0x658] sm:$0xf0] }
 0x169   :  { %v3793_v11 = vld [vmem:[#allocation8 + $0x418] sm:$0xf0]  ;;  %v4084_v12 = vor.u32 %v4687_v1, %v4081_v3 }
 0x16a   :  { %2578 = vmatpush.bf16.msra.mxu2 %v3572_v15  ;;  %2552 = vmatpush.bf16.msra.mxu0 %v3284_v24  ;;  %v5115_v13 = vpop.f32.mrf.mxu0  ;;  %v4129_v15 = vld [vmem:[#allocation8 + $0x6b8] sm:$0xf0] }
 0x16b   :  { %2592 = vmatpush.bf16.msra.mxu3 %v3700_v19  ;;  %2566 = vmatpush.bf16.msra.mxu1 %v3412_v28  ;;  %v5119_v19 = vpop.f32.mrf.mxu1  ;;  %v4132_v24 = vor.u32 %v4699_v14, %v4129_v15  ;;  %v4260_v28 = vor.u32 %v4731_v17, %v4257_v18  ;;  %v3921_v14 = vld [vmem:[#allocation8 + $0x518] sm:$0xf0]  ;;  %v5133_v15 = vld [vmem:[#allocation10] sm:$0xf]  ;;  %v4683_v18 = vld [vmem:[#allocation8 + $0x62c] sm:$0xf] }
 0x16d   :  { %2553 = vmatmul.bf16.vlgmr.msra.gmra.mxu0 %v5057_v26  ;;  %v3857_v26 = vld [vmem:[#allocation8 + $0x498] sm:$0xf0] }
 0x16e   :  { %2601 = vmatpush.bf16.msrb.mxu0 %v3908_v29  ;;  %2579 = vmatpush.bf16.msra.mxu2 %v3556_v33  ;;  %v3860_v16 = vor.u32 %v4631_v9, %v3857_v26  ;;  %v4695_v29 = vld [vmem:[#allocation8 + $0x68c] sm:$0xf]  ;;  %v5123_v34 = vpop.f32.mrf.mxu3 }
 0x16f   :  { %2615 = vmatpush.bf16.msrb.mxu1 %v4036_v32  ;;  %2593 = vmatpush.bf16.msra.mxu3 %v3684_v37  ;;  %v3844_v32 = vor.u32 %v4627_v21, %v3841_v22  ;;  %v4727_v33 = vld [vmem:[#allocation8 + $0x78c] sm:$0xf]  ;;  %v3825_v37 = vld [vmem:[#allocation8 + $0x458] sm:$0xf0] }
 0x170   :  { %2567 = vmatmul.bf16.vlgmr.msra.gmra.mxu1 %v5059_v31  ;;  %v4276_v31 = vor.u32 %v4735_v5, %v4273_v7  ;;  %v3828_v46 = vor.u32 %v4623_v36, %v3825_v37  ;;  %v3812_v5 = vor.u32 %v4619_v51, %v3809_v52  ;;  %v4719_v7 = vld [vmem:[#allocation8 + $0x74c] sm:$0xf] }
 0x171   :  { %v4715_v22 = vld [vmem:[#allocation8 + $0x72c] sm:$0xf] }
 0x172   :  { %2602 = vmatpush.bf16.msrb.mxu0 %v3892_v45  ;;  %2580 = vmatpush.bf16.msra.mxu2 %v3540_v50  ;;  %v5125_v41 = vpop.f32.mrf.mxu0  ;;  %v4097_v45 = vld [vmem:[#allocation8 + $0x678] sm:$0xf0]  ;;  %v3956_v50 = vor.u32 %v4655_v39, %v3953_v40  ;;  %v4711_v37 = vld [vmem:[#allocation8 + $0x70c] sm:$0xf] }
 0x173   :  { %2616 = vmatpush.bf16.msrb.mxu1 %v4020_v49  ;;  %2594 = vmatpush.bf16.msra.mxu3 %v3668_v55  ;;  %v4225_v49 = vld [vmem:[#allocation8 + $0x778] sm:$0xf0]  ;;  %v4100_v55 = vor.u32 %v4691_v44, %v4097_v45  ;;  %v5127_v58 = vpop.f32.mrf.mxu1 }
 0x175   :  { %2581 = vmatmul.bf16.vlgmr.msra.gmra.mxu2 %v5063_v54  ;;  %v4113_v54 = vld [vmem:[#allocation8 + $0x698] sm:$0xf0] }
 0x176   :  { %2629 = vmatpush.bf16.msrb.mxu2 %v4164_v56  ;;  %2603 = vmatpush.bf16.msrb.mxu0 %v3876_v4  ;;  %v4116_v38 = vor.u32 %v4695_v29, %v4113_v54  ;;  %v4651_v56 = vld [vmem:[#allocation8 + $0x52c] sm:$0xf]  ;;  %v4757_v54 = vld [vmem:[#allocation11 + $0x78] sm:$0xff] }
 0x177   :  { %2643 = vmatpush.bf16.msrb.mxu3 %v4292_v63  ;;  %2617 = vmatpush.bf16.msrb.mxu1 %v4004_v8  ;;  %v4228_v63 = vor.u32 %v4723_v47, %v4225_v49  ;;  %v5129_v4 = vpop.f32.mrf.mxu2  ;;  %v4209_v8 = vld [vmem:[#allocation8 + $0x758] sm:$0xf0]  ;;  %v5131_v9 = vpop.f32.mrf.mxu3  ;;  %v3940_v26 = vor.u32 %v4651_v56, %v3937_v57 }
 0x178   :  { %2595 = vmatmul.bf16.vlgmr.msra.gmra.mxu3 %v5065_v60  ;;  %v4241_v60 = vld [vmem:[#allocation8 + $0x798] sm:$0xf0]  ;;  %v4212_v17 = vor.u32 %v4719_v7, %v4209_v8 }
 0x179   :  { %v4244_v43 = vor.u32 %v4727_v33, %v4241_v60  ;;  %v4679_v33 = vld [vmem:[#allocation8 + $0x60c] sm:$0xf]  ;;  %v4049_v60 = vld [vmem:[#allocation8 + $0x618] sm:$0xf0] }
 0x17a   :  { %2630 = vmatpush.bf16.msrb.mxu2 %v4148_v10  ;;  %2604 = vmatpush.bf16.msrb.mxu0 %v3860_v16  ;;  %v4615_v10 = vld [vmem:[#allocation8 + $0x40c] sm:$0xf]  ;;  %v2330_v16 = vpop.f32.mrf.mxu0  ;;  %v4052_v45 = vor.u32 %v4679_v33, %v4049_v60 }
 0x17b   :  { %2644 = vmatpush.bf16.msrb.mxu3 %v4276_v31  ;;  %2618 = vmatpush.bf16.msrb.mxu1 %v3988_v20  ;;  %v4647_v31 = vld [vmem:[#allocation8 + $0x50c] sm:$0xf]  ;;  %v4065_v20 = vld [vmem:[#allocation8 + $0x638] sm:$0xf0]  ;;  %v3796_v21 = vor.u32 %v4615_v10, %v3793_v11  ;;  %v2344_v39 = vpop.f32.mrf.mxu1 }
 0x17c   :  { %v3924_v25 = vor.u32 %v4647_v31, %v3921_v14  ;;  %v4068_v29 = vor.u32 %v4683_v18, %v4065_v20  ;;  %v4752_v14 = vld [vmem:[#allocation11 + $0x50] sm:$0xff]  ;;  %v4743_v20 = vld [vmem:[#allocation11 + $0x8] sm:$0xff] }
 0x17e   :  { %2631 = vmatpush.bf16.msrb.mxu2 %v4132_v24  ;;  %2605 = vmatpush.bf16.msrb.mxu0 %v3844_v32  ;;  %v4193_v24 = vld [vmem:[#allocation8 + $0x738] sm:$0xf0] }
 0x17f   :  { %2645 = vmatpush.bf16.msrb.mxu3 %v4260_v28  ;;  %2619 = vmatpush.bf16.msrb.mxu1 %v3972_v35  ;;  %v921_v28 = vperm.slane %v5133_v15, 0  ;;  %v4196_v32 = vor.u32 %v4715_v22, %v4193_v24  ;;  %v2304_v36 = vpop.f32.mrf.mxu2  ;;  %v2318_v40 = vpop.f32.mrf.mxu3 }
 0x181   :  { %v2221_v35 = vadd.f32 %v5105_v42, %v921_v28  ;;  %v2219_v44 = vadd.f32 %v5101_v59, %v921_v28  ;;  %v922_v59 = vperm.slane %v5133_v15, 1 }
 0x182   :  { %2632 = vmatpush.bf16.msrb.mxu2 %v4116_v38  ;;  %2606 = vmatpush.bf16.msrb.mxu0 %v3828_v46  ;;  %v4177_v38 = vld [vmem:[#allocation8 + $0x718] sm:$0xf0]  ;;  %v4756_v46 = vld [vmem:[#allocation11 + $0x70] sm:$0xff]  ;;  %v2332_v49 = vpop.f32.mrf.mxu0 }
 0x183   :  { %2646 = vmatpush.bf16.msrb.mxu3 %v4244_v43  ;;  %2620 = vmatpush.bf16.msrb.mxu1 %v3956_v50  ;;  %v4748_v43 = vld [vmem:[#allocation11 + $0x30] sm:$0xff]  ;;  %v4180_v47 = vor.u32 %v4711_v37, %v4177_v38  ;;  %v2235_v42 = vadd.f32 %v5107_v48, %v2221_v35  ;;  %v4747_v50 = vld [vmem:[#allocation11 + $0x28] sm:$0xff]  ;;  %v2233_v51 = vadd.f32 %v5103_v6, %v2219_v44  ;;  %v4754_v6 = vld [vmem:[#allocation11 + $0x60] sm:$0xff] }
 0x185   :  { %v2249_v52 = vadd.f32 %v5121_v30, %v2235_v42  ;;  %v2346_v30 = vpop.f32.mrf.mxu1  ;;  %v4764_v42 = vld [vmem:[#allocation11 + $0xb0] sm:$0xff] }
 0x186   :  { %2633 = vmatpush.bf16.msrb.mxu2 %v4100_v55  ;;  %2607 = vmatpush.bf16.msrb.mxu0 %v3812_v5  ;;  %v4755_v55 = vld [vmem:[#allocation11 + $0x68] sm:$0xff] }
 0x187   :  { %2647 = vmatpush.bf16.msrb.mxu3 %v4228_v63  ;;  %2621 = vmatpush.bf16.msrb.mxu1 %v3940_v26  ;;  %v2358_v56 = vpop.f32.mrf.mxu2  ;;  %v2372_v57 = vpop.f32.mrf.mxu3  ;;  %v2263_v48 = vadd.f32 %v5123_v34, %v2249_v52  ;;  %v2331_v63 = vadd.f32 %v2330_v16, %v922_v59  ;;  %v4753_v26 = vld [vmem:[#allocation11 + $0x58] sm:$0xff] }
 0x188   :  { %v4761_v52 = vld [vmem:[#allocation11 + $0x98] sm:$0xff] }
 0x189   :  { %v2277_v3 = vadd.f32 %v5125_v41, %v2263_v48  ;;  %v2345_v7 = vadd.f32 %v2344_v39, %v2331_v63  ;;  %v923_v63 = vperm.slane %v5133_v15, 2 }
 0x18a   :  { %2634 = vmatpush.bf16.msrb.mxu2 %v4084_v12  ;;  %2608 = vmatpush.bf16.msrb.mxu0 %v3796_v21  ;;  %v2386_v8 = vpop.f32.mrf.mxu0  ;;  %v4744_v12 = vld [vmem:[#allocation11 + $0x10] sm:$0xff] }
 0x18b   :  { %2648 = vmatpush.bf16.msrb.mxu3 %v4212_v17  ;;  %2622 = vmatpush.bf16.msrb.mxu1 %v3924_v25  ;;  %v2291_v34 = vadd.f32 %v5127_v58, %v2277_v3  ;;  %v2359_v10 = vadd.f32 %v2358_v56, %v2345_v7  ;;  %v4751_v58 = vld [vmem:[#allocation11 + $0x48] sm:$0xff] }
 0x18d   :  { %2609 = vmatmul.bf16.vlgmr.msrb.gmra.mxu0 %v5073_v23  ;;  %v2247_v23 = vadd.f32 %v5109_v53, %v2233_v51  ;;  %v4745_v53 = vld [vmem:[#allocation11 + $0x18] sm:$0xff]  ;;  %v2305_v31 = vadd.f32 %v2304_v36, %v2291_v34  ;;  %v2373_v16 = vadd.f32 %v2372_v57, %v2359_v10  ;;  %v2400_v18 = vpop.f32.mrf.mxu1  ;;  %v4762_v51 = vld [vmem:[#allocation11 + $0xa0] sm:$0xff] }
 0x18e   :  { %2929 = vmatpush.bf16.msra.mxu0 %v4749_v2  ;;  %2635 = vmatpush.bf16.msrb.mxu2 %v4068_v29  ;;  %v4742_v29 = vld [vmem:[#allocation11] sm:$0xff] }
 0x18f   :  { %2943 = vmatpush.bf16.msra.mxu1 %v4757_v54  ;;  %2649 = vmatpush.bf16.msrb.mxu3 %v4196_v32  ;;  %v2261_v1 = vadd.f32 %v5112_v61, %v2247_v23  ;;  %v2374_v11 = vpop.f32.mrf.mxu3  ;;  %v2319_v21 = vadd.f32 %v2318_v40, %v2305_v31  ;;  %v2387_v24 = vadd.f32 %v2386_v8, %v2373_v16  ;;  %v4759_v23 = vld [vmem:[#allocation11 + $0x88] sm:$0xff]  ;;  %v4758_v57 = vld [vmem:[#allocation11 + $0x80] sm:$0xff] }
 0x190   :  { %2623 = vmatmul.bf16.vlgmr.msrb.gmra.mxu1 %v5075_v27  ;;  %v4746_v27 = vld [vmem:[#allocation11 + $0x20] sm:$0xff] }
 0x191   :  { %v2275_v5 = vadd.f32 %v5115_v13, %v2261_v1  ;;  %v2661_v54 = vmax.f32 %v2319_v21, 0.0  ;;  %v2401_v33 = vadd.f32 %v2400_v18, %v2387_v24  ;;  %v4773_v21 = vld [vmem:[#allocation11 + $0xf8] sm:$0xff] }
 0x192   :  { %2930 = vmatpush.bf16.msra.mxu0 %v4748_v43  ;;  %2636 = vmatpush.bf16.msrb.mxu2 %v4052_v45  ;;  %v2388_v2 = vpop.f32.mrf.mxu0 }
 0x193   :  { %2944 = vmatpush.bf16.msra.mxu1 %v4756_v46  ;;  %2650 = vmatpush.bf16.msrb.mxu3 %v4180_v47  ;;  %v2289_v61 = vadd.f32 %v5119_v19, %v2275_v5 }
 0x195   :  { %2637 = vmatmul.bf16.vlgmr.msrb.gmra.mxu2 %v5079_v62  ;;  %v2333_v62 = vadd.f32 %v2332_v49, %v922_v59  ;;  %v2303_v13 = vadd.f32 %v5129_v4, %v2289_v61  ;;  %v4750_v4 = vld [vmem:[#allocation11 + $0x40] sm:$0xff]  ;;  %v2402_v37 = vpop.f32.mrf.mxu1 }
 0x196   :  { %2931 = vmatpush.bf16.msra.mxu0 %v4747_v50  ;;  %2651 = vmatmul.bf16.vlgmr.msrb.gmra.mxu3 %v5081_v0  ;;  %v2360_v0 = vpop.f32.mrf.mxu2  ;;  %v4763_v50 = vld [vmem:[#allocation11 + $0xa8] sm:$0xff] }
 0x197   :  { %2945 = vmatpush.bf16.msra.mxu1 %v4755_v55  ;;  %v2347_v41 = vadd.f32 %v2346_v30, %v2333_v62  ;;  %v2317_v22 = vadd.f32 %v5131_v9, %v2303_v13  ;;  %v4765_v9 = vld [vmem:[#allocation11 + $0xb8] sm:$0xff]  ;;  %v4760_v55 = vld [vmem:[#allocation11 + $0x90] sm:$0xff]  ;;  %2971 = vmatpush.bf16.msra.mxu3 %v4773_v21 }
 0x198   :  { %2957 = vmatpush.bf16.msra.mxu2 %v4765_v9 }
 0x199   :  { %v2361_v17 = vadd.f32 %v2360_v0, %v2347_v41  ;;  %v2657_v32 = vmax.f32 %v2317_v22, 0.0 }
 0x19a   :  { %2932 = vmatpush.bf16.msra.mxu0 %v4746_v27 }
 0x19b   :  { %2946 = vmatpush.bf16.msra.mxu1 %v4754_v6  ;;  %v2375_v25 = vadd.f32 %v2374_v11, %v2361_v17  ;;  %v2428_v28 = vpop.f32.mrf.mxu3  ;;  %v2665_v35 = vpack.c.bf16 %v2661_v54, %v2657_v32  ;;  %v4771_v54 = vld [vmem:[#allocation11 + $0xe8] sm:$0xff]  ;;  %v4769_v32 = vld [vmem:[#allocation11 + $0xd8] sm:$0xff] }
 0x19c   :  { %2958 = vmatpush.bf16.msra.mxu2 %v4764_v42 }
 0x19d   :  { %v2389_v60 = vadd.f32 %v2388_v2, %v2375_v25 }
 0x19e   :  { %2933 = vmatpush.bf16.msra.mxu0 %v4745_v53  ;;  %v2414_v19 = vpop.f32.mrf.mxu2 }
 0x19f   :  { %2947 = vmatpush.bf16.msra.mxu1 %v4753_v26  ;;  %v2415_v36 = vadd.f32 %v2414_v19, %v2401_v33  ;;  %v2403_v38 = vadd.f32 %v2402_v37, %v2389_v60  ;;  %v4768_v60 = vld [vmem:[#allocation11 + $0xd0] sm:$0xff]  ;;  %v4766_v37 = vld [vmem:[#allocation11 + $0xc0] sm:$0xff] }
 0x1a0   :  { %2959 = vmatpush.bf16.msra.mxu2 %v4763_v50 }
 0x1a1   :  { %v2429_v40 = vadd.f32 %v2428_v28, %v2415_v36 }
 0x1a2   :  { %2934 = vmatpush.bf16.msra.mxu0 %v4744_v12 }
 0x1a3   :  { %2948 = vmatpush.bf16.msra.mxu1 %v4752_v14  ;;  %v2430_v44 = vpop.f32.mrf.mxu3  ;;  %v2658_v46 = vmax.f32 %v2429_v40, 0.0 }
 0x1a4   :  { %2960 = vmatpush.bf16.msra.mxu2 %v4762_v51 }
 0x1a6   :  { %2935 = vmatpush.bf16.msra.mxu0 %v4743_v20  ;;  %v2416_v39 = vpop.f32.mrf.mxu2 }
 0x1a7   :  { %2949 = vmatpush.bf16.msra.mxu1 %v4751_v58  ;;  %v2417_v43 = vadd.f32 %v2416_v39, %v2403_v38  ;;  %v924_v39 = vperm.slane %v5133_v15, 3 }
 0x1a8   :  { %2961 = vmatpush.bf16.msra.mxu2 %v4761_v52 }
 0x1a9   :  { %v2431_v45 = vadd.f32 %v2430_v44, %v2417_v43 }
 0x1aa   :  { %2936 = vmatpush.bf16.msra.mxu0 %v4742_v29  ;;  %v2442_v59 = vpop.f32.mrf.mxu0  ;;  %v4772_v29 = vld [vmem:[#allocation11 + $0xf0] sm:$0xff] }
 0x1ab   :  { %2950 = vmatpush.bf16.msra.mxu1 %v4750_v4  ;;  %v2662_v47 = vmax.f32 %v2431_v45, 0.0  ;;  %v2443_v30 = vadd.f32 %v2442_v59, %v923_v63  ;;  %2972 = vmatpush.bf16.msra.mxu3 %v4772_v29  ;;  %v4770_v4 = vld [vmem:[#allocation11 + $0xe0] sm:$0xff] }
 0x1ac   :  { %2962 = vmatpush.bf16.msra.mxu2 %v4760_v55 }
 0x1ad   :  { %2937 = vmatmul.bf16.vlgmr.msra.gmra.mxu0 %v2665_v35  ;;  %v2666_v49 = vpack.c.bf16 %v2662_v47, %v2658_v46  ;;  %v2456_v56 = vpop.f32.mrf.mxu1  ;;  %v4767_v35 = vld [vmem:[#allocation11 + $0xc8] sm:$0xff] }
 0x1ae   :  { %v2457_v53 = vadd.f32 %v2456_v56, %v2443_v30 }
 0x1af   :  { %2951 = vmatmul.bf16.vlgmr.msra.gmra.mxu1 %v2666_v49  ;;  %2973 = vmatpush.bf16.msra.mxu3 %v4771_v54 }
 0x1b0   :  { %2963 = vmatpush.bf16.msra.mxu2 %v4759_v23 }
 0x1b2   :  { %v2444_v27 = vpop.f32.mrf.mxu0 }
 0x1b3   :  { %v2445_v5 = vadd.f32 %v2444_v27, %v923_v63  ;;  %2974 = vmatpush.bf16.msra.mxu3 %v4770_v4 }
 0x1b4   :  { %2964 = vmatpush.bf16.msra.mxu2 %v4758_v57 }
 0x1b5   :  { %v2458_v1 = vpop.f32.mrf.mxu1 }
 0x1b6   :  { %v2459_v26 = vadd.f32 %v2458_v1, %v2445_v5 }
 0x1b7   :  { %2975 = vmatpush.bf16.msra.mxu3 %v4769_v32 }
 0x1b8   :  { %v2470_v48 = vpop.f32.mrf.mxu2 }
 0x1b9   :  { %v2471_v62 = vadd.f32 %v2470_v48, %v2457_v53 }
 0x1bb   :  { %v2484_v6 = vpop.f32.mrf.mxu3  ;;  %2976 = vmatpush.bf16.msra.mxu3 %v4768_v60 }
 0x1bc   :  { %v2485_v10 = vadd.f32 %v2484_v6, %v2471_v62 }
 0x1bf   :  { %2977 = vmatpush.bf16.msra.mxu3 %v4767_v35 }
 0x1c0   :  { %v2472_v7 = vpop.f32.mrf.mxu2 }
 0x1c1   :  { %v2473_v0 = vadd.f32 %v2472_v7, %v2459_v26 }
 0x1c3   :  { %v2486_v8 = vpop.f32.mrf.mxu3  ;;  %2978 = vmatpush.bf16.msra.mxu3 %v4766_v37 }
 0x1c4   :  { %v2487_v31 = vadd.f32 %v2486_v8, %v2473_v0  ;;  %v4789_v0 = vld [vmem:[%s5169_s6] ss:$0 sm:$0xff]  ;;  %s4981_s6 = smov 128  }
 0x1ca   :  { %v2498_v3 = vpop.f32.mrf.mxu0 }
 0x1cb   :  { %v2499_v11 = vadd.f32 %v2498_v3, %v2485_v10 }
 0x1cd   :  { %v2512_v34 = vpop.f32.mrf.mxu1 }
 0x1ce   :  { %v2513_v14 = vadd.f32 %v2512_v34, %v2499_v11 }
 0x1d2   :  { %v2500_v12 = vpop.f32.mrf.mxu0 }
 0x1d3   :  { %v2501_v13 = vadd.f32 %v2500_v12, %v2487_v31 }
 0x1d5   :  { %v2514_v17 = vpop.f32.mrf.mxu1 }
 0x1d6   :  { %v2515_v18 = vadd.f32 %v2514_v17, %v2501_v13 }
 0x1d8   :  { %v2526_v61 = vpop.f32.mrf.mxu2 }
 0x1d9   :  { %v2527_v16 = vadd.f32 %v2526_v61, %v2513_v14 }
 0x1db   :  { %v2540_v41 = vpop.f32.mrf.mxu3 }
 0x1dc   :  { %v2541_v58 = vadd.f32 %v2540_v41, %v2527_v16 }
 0x1de   :  { %v2659_v2 = vmax.f32 %v2541_v58, 0.0 }
 0x1e0   :  { %v2528_v20 = vpop.f32.mrf.mxu2 }
 0x1e1   :  { %v2529_v22 = vadd.f32 %v2528_v20, %v2515_v18 }
 0x1e3   :  { %v2542_v24 = vpop.f32.mrf.mxu3 }
 0x1e4   :  { %v2543_v25 = vadd.f32 %v2542_v24, %v2529_v22 }
 0x1e6   :  { %v2663_v19 = vmax.f32 %v2543_v25, 0.0 }
 0x1e8   :  { %v2667_v28 = vpack.c.bf16 %v2663_v19, %v2659_v2 }
 0x1ea   :  { %2965 = vmatmul.bf16.vlgmr.msra.gmra.mxu2 %v2667_v28  ;;  %v2554_v33 = vpop.f32.mrf.mxu0 }
 0x1eb   :  { %v2555_v43 = vadd.f32 %v2554_v33, %v924_v39 }
 0x1ed   :  { %v2568_v36 = vpop.f32.mrf.mxu1 }
 0x1ee   :  { %v2569_v46 = vadd.f32 %v2568_v36, %v2555_v43 }
 0x1f2   :  { %v2556_v38 = vpop.f32.mrf.mxu0 }
 0x1f3   :  { %v2557_v47 = vadd.f32 %v2556_v38, %v924_v39 }
 0x1f5   :  { %v2570_v44 = vpop.f32.mrf.mxu1 }
 0x1f6   :  { %v2571_v51 = vadd.f32 %v2570_v44, %v2557_v47 }
 0x1f8   :  { %v2582_v9 = vpop.f32.mrf.mxu2 }
 0x1f9   :  { %v2583_v49 = vadd.f32 %v2582_v9, %v2569_v46 }
 0x1fb   :  { %v2596_v40 = vpop.f32.mrf.mxu3 }
 0x1fc   :  { %v2597_v59 = vadd.f32 %v2596_v40, %v2583_v49 }
 0x200   :  { %v2584_v42 = vpop.f32.mrf.mxu2 }
 0x201   :  { %v2585_v55 = vadd.f32 %v2584_v42, %v2571_v51 }
 0x203   :  { %v2598_v50 = vpop.f32.mrf.mxu3 }
 0x204   :  { %v2599_v27 = vadd.f32 %v2598_v50, %v2585_v55 }
 0x20a   :  { %v2610_v45 = vpop.f32.mrf.mxu0 }
 0x20b   :  { %v2611_v23 = vadd.f32 %v2610_v45, %v2597_v59 }
 0x20d   :  { %v2624_v52 = vpop.f32.mrf.mxu1 }
 0x20e   :  { %v2625_v15 = vadd.f32 %v2624_v52, %v2611_v23 }
 0x212   :  { %v2612_v56 = vpop.f32.mrf.mxu0 }
 0x213   :  { %v2613_v63 = vadd.f32 %v2612_v56, %v2599_v27 }
 0x215   :  { %v2626_v30 = vpop.f32.mrf.mxu1 }
 0x216   :  { %v2627_v1 = vadd.f32 %v2626_v30, %v2613_v63 }
 0x218   :  { %v2638_v57 = vpop.f32.mrf.mxu2 }
 0x219   :  { %v2652_v48 = vpop.f32.mrf.mxu3  ;;  %v2639_v6 = vadd.f32 %v2638_v57, %v2625_v15 }
 0x21b   :  { %v2653_v53 = vadd.f32 %v2652_v48, %v2639_v6 }
 0x21d   :  { %v2660_v8 = vmax.f32 %v2653_v53, 0.0 }
 0x220   :  { %v2640_v3 = vpop.f32.mrf.mxu2 }
 0x221   :  { %v2641_v5 = vadd.f32 %v2640_v3, %v2627_v1  ;;  %v2654_v7 = vpop.f32.mrf.mxu3 }
 0x223   :  { %v2655_v62 = vadd.f32 %v2654_v7, %v2641_v5 }
 0x225   :  { %v2664_v26 = vmax.f32 %v2655_v62, 0.0 }
 0x227   :  { %v2668_v34 = vpack.c.bf16 %v2664_v26, %v2660_v8 }
 0x229   :  { %2979 = vmatmul.bf16.vlgmr.msra.gmra.mxu3 %v2668_v34 }
 0x22a   :  { %v2938_v10 = vpop.f32.mrf.mxu0 }
 0x22b   :  { %v2939_v61 = vadd.f32 %v4789_v0, %v2938_v10 }
 0x22c   :  { %v2952_v11 = vpop.f32.mrf.mxu1 }
 0x22d   :  { %v2953_v31 = vadd.f32 %v2952_v11, %v2939_v61 }
 0x232   :  { %v2940_v14 = vpop.f32.mrf.mxu0 }
 0x233   :  { %v2941_v18 = vadd.f32 %v4789_v0, %v2940_v14 }
 0x234   :  { %v2954_v17 = vpop.f32.mrf.mxu1 }
 0x235   :  { %v2955_v21 = vadd.f32 %v2954_v17, %v2941_v18 }
 0x26d   :  { %v2966_v12 = vpop.f32.mrf.mxu2 }
 0x26e   :  { %v2967_v41 = vadd.f32 %v2966_v12, %v2953_v31 }
 0x275   :  { %v2968_v20 = vpop.f32.mrf.mxu2 }
 0x276   :  { %v2969_v58 = vadd.f32 %v2968_v20, %v2955_v21 }
 0x2ac   :  { %v2980_v13 = vpop.f32.mrf.mxu3 }
 0x2ad   :  { %v2981_v16 = vadd.f32 %v2980_v13, %v2967_v41 }
 0x2af   :  { %2985 = vst [vmem:[#allocation13] sm:$0xff] %v2981_v16 }
 0x2b4   :  { %v2982_v22 = vpop.f32.mrf.mxu3 }
 0x2b5   :  { %v2983_v24 = vadd.f32 %v2982_v22, %v2969_v58 }
 0x2b7   :  { %2986 = vst [vmem:[#allocation13 + $0x8] sm:$0xff] %v2983_v24 }
 0x2b8   :  { %2999 = dma.vmem_to_hbm [thread:$0]  %s2992_s11, 256, %s2994_s14, [#allocation4], %s4981_s6, %s4981_s6, %s4982_s1  }
 0x2b9   :  { %4966 = dma.done.wait [#allocation4], 256  }
 0x2ba   :  { %4967 = vsyncadd [#allocation4], 4294967040 }
 0x2bb   :  { %3004 = vsyncpa [#allocation3], 1 }
 0x2bc   :  { %3005 = vsyncpa [#allocation6], 1 }
 0x2bd   :  { %3006 = vsyncpa [#allocation9], 1 }
 0x2be   :  { %3007 = vsyncpa [#allocation12], 1 }
 0x2bf   :  { %3008 = vsyncpa [#allocation4], 1 }

</bundles_post_ra>
